<compile_context>
chip_gen: v7x
topology: tpu7x:2x2x1
jax: 0.10.0
libtpu: 0.0.40
codegen_flags: <defaults>
</compile_context>

<pallas_src>
import jax
import jax.numpy as jnp
from jax.experimental import pallas as pl
from jax.experimental.pallas import tpu as pltpu


def _round_up(x, m):
    return (x + m - 1) // m * m


def _nbytes(*arrs):
    return sum(int(a.size) * a.dtype.itemsize for a in arrs)


# ---------------------------------------------------------------------------
# Kernel 1: point-wise MLP (3 -> 64 -> 128 -> 1024) + running max over points.
# Grid: (B, num_point_tiles).  Output block (1, 1024) per batch is resident
# across the tile axis and used as the running-max accumulator.
# ---------------------------------------------------------------------------
def _point_mlp_max_kernel(x_ref, w1_ref, b1_ref, w2_ref, b2_ref, w3_ref,
                          pooled_ref):
    t = pl.program_id(1)

    # x tile is (C, tile) bf16 (lane-dense point axis); contract the channel
    # (sublane) axis against W1 directly -> (tile, 64), bf16 in / f32 acc.
    h = jax.lax.dot_general(x_ref[...], w1_ref[...], (((0,), (0,)), ((), ())),
                            preferred_element_type=jnp.float32)
    h = jnp.maximum(h + b1_ref[...], 0.0)                        # conv1+bn1+relu

    h = jnp.dot(h.astype(jnp.bfloat16), w2_ref[...],
                preferred_element_type=jnp.float32)
    h = jnp.maximum(h + b2_ref[...], 0.0)                        # conv2+bn2+relu

    # conv3: raw matmul only.  Its bias + ReLU commute with the per-channel max
    # over points, so they are applied exactly once per batch in the FC-head
    # kernel -- removing the (tile, 1024) add + max-with-0 from the hot path.
    h = jnp.dot(h.astype(jnp.bfloat16), w3_ref[...],
                preferred_element_type=jnp.float32)              # (tile, 1024) f32

    # bf16 row-max: halves the vregs touched by the reduce on bf16-capable
    # VALUs (v6e/v7x); on v5e the kernel is MXU-bound so this is neutral.
    hb = h.astype(jnp.bfloat16)

    @pl.when(t == 0)
    def _():
        # Pre-activation values can be negative, so init to -inf (not 0).
        pooled_ref[...] = jnp.full_like(pooled_ref, -jnp.inf)

    pooled_ref[...] = jnp.maximum(
        pooled_ref[...],
        jnp.max(hb, axis=0, keepdims=True).astype(jnp.float32))


# ---------------------------------------------------------------------------
# Kernel 2: hoisted conv3 bias+ReLU, then FC head (1024 -> 512 -> 256 -> 9).
# The flattened 3x3 identity is pre-folded into bf3 (no captured constants).
# ---------------------------------------------------------------------------
def _fc_head_kernel(g_ref, b3_ref, wf1_ref, bf1_ref, wf2_ref, bf2_ref,
                    wf3_ref, bf3_ref, out_ref):
    g = jnp.maximum(g_ref[...] + b3_ref[...], 0.0)               # conv3 bias+bn3+relu (hoisted)
    g = jnp.dot(g.astype(jnp.bfloat16), wf1_ref[...],
                preferred_element_type=jnp.float32)
    g = jnp.maximum(g + bf1_ref[...], 0.0)                       # fc1+bn4+relu
    g = jnp.dot(g.astype(jnp.bfloat16), wf2_ref[...],
                preferred_element_type=jnp.float32)
    g = jnp.maximum(g + bf2_ref[...], 0.0)                       # fc2+bn5+relu
    out_ref[...] = jnp.dot(g.astype(jnp.bfloat16), wf3_ref[...],
                           preferred_element_type=jnp.float32) + bf3_ref[...]


# ---------------------------------------------------------------------------
# Parameter construction / BatchNorm folding (glue, not hot path).
# ---------------------------------------------------------------------------
def init_params(key, point_size=3):
    """Synthetic STN3d parameters in PyTorch-like shapes (eval-mode BN stats)."""
    dims = [(point_size, 64), (64, 128), (128, 1024),
            (1024, 512), (512, 256), (256, 9)]
    keys = iter(jax.random.split(key, 32))
    layers = []
    for li, (cin, cout) in enumerate(dims):
        w = jax.random.normal(next(keys), (cout, cin), jnp.float32) / jnp.sqrt(
            jnp.float32(cin))
        b = 0.05 * jax.random.normal(next(keys), (cout,), jnp.float32)
        bn = None
        if li < 5:  # bn1..bn5 (fc3 has no BN)
            gamma = 1.0 + 0.1 * jax.random.normal(next(keys), (cout,), jnp.float32)
            beta = 0.05 * jax.random.normal(next(keys), (cout,), jnp.float32)
            rmean = 0.1 * jax.random.normal(next(keys), (cout,), jnp.float32)
            rvar = 1.0 + 0.1 * jax.random.uniform(next(keys), (cout,), jnp.float32)
            bn = (gamma, beta, rmean, rvar)
        layers.append((w, b, bn))
    return layers


_IDENTITY9 = (1., 0., 0., 0., 1., 0., 0., 0., 1.)


def fold_params(layers, eps=1e-5):
    """Fold eval-mode BN into W/b; transpose to (cin, cout); cast for the MXU.

    All matmul weights are bf16 (MXU inputs); biases stay f32 (added after the
    f32 accumulation).  The flattened 3x3 identity is folded into the fc3 bias
    so no kernel needs to capture a constant array.
    """
    folded = []
    for li, (w, b, bn) in enumerate(layers):
        if bn is not None:
            gamma, beta, rmean, rvar = bn
            s = gamma / jnp.sqrt(rvar + eps)
            w = w * s[:, None]
            b = b * s + (beta - rmean * s)
        if li == 5:  # fc3: fold the flattened 3x3 identity into the bias
            b = b + jnp.asarray(_IDENTITY9, dtype=jnp.float32)
        folded.append(jnp.asarray(w.T, dtype=jnp.bfloat16))      # (cin, cout)
        folded.append(jnp.asarray(b.reshape(1, -1), dtype=jnp.float32))
    return folded


# ---------------------------------------------------------------------------
# Generation-aware tiling (v5e/v6e: 128 MiB VMEM -> big tiles; v7x: 64 MiB).
# ---------------------------------------------------------------------------
def _pick_tiling(tile_points):
    vmem_cap = 0
    try:
        vmem_cap = int(getattr(pltpu.get_tpu_info(), "vmem_capacity_bytes", 0))
    except Exception:  # interpret mode / non-TPU backend / older API
        vmem_cap = 0
    if vmem_cap >= 96 * 1024 * 1024:          # v5e / v6e (128 MiB VMEM)
        return (tile_points or 2048), 64 * 1024 * 1024
    # v7x (64 MiB physical VMEM) or unknown: stay conservative.
    return (tile_points or 1024), 32 * 1024 * 1024


# ---------------------------------------------------------------------------
# Forward wrapper.
# ---------------------------------------------------------------------------
def stn3d_forward(x, folded_params, *, tile_points=None):
    """x: (B, point_size, N) float32 -> (B, 3, 3) float32 (eval-mode STN3d)."""
    B, C, N = x.shape
    (w1, b1, w2, b2, w3, b3, wf1, bf1, wf2, bf2, wf3, bf3) = folded_params

    tile_cap, vmem_limit = _pick_tiling(tile_points)
    tile = min(tile_cap, _round_up(N, 128))
    n_pad = _round_up(N, tile)
    n_tiles = n_pad // tile

    # Edge-pad (duplicate the last real point): padded columns reproduce a real
    # point's activations, so the max over points needs no masking on any tile.
    x_p = x if n_pad == N else jnp.pad(
        x, ((0, 0), (0, 0), (0, n_pad - N)), mode="edge")
    x_p = x_p.astype(jnp.bfloat16)     # halve input DMA; lane-dense (B, C, n_pad)

    def const_spec(arr):
        # Weights/biases stay VMEM-resident across the whole grid.
        nd = arr.ndim
        return pl.BlockSpec(arr.shape, lambda b, t, _nd=nd: (0,) * _nd)

    pooled = pl.pallas_call(
        _point_mlp_max_kernel,
        out_shape=jax.ShapeDtypeStruct((B, 1, 1024), jnp.float32),
        grid=(B, n_tiles),
        in_specs=[
            pl.BlockSpec((None, C, tile), lambda b, t: (b, 0, t)),
            const_spec(w1), const_spec(b1),
            const_spec(w2), const_spec(b2),
            const_spec(w3),
        ],
        out_specs=pl.BlockSpec((None, 1, 1024), lambda b, t: (b, 0, 0)),
        compiler_params=pltpu.CompilerParams(
            dimension_semantics=("parallel", "arbitrary"),
            vmem_limit_bytes=vmem_limit),
        cost_estimate=pl.CostEstimate(
            flops=2 * B * n_pad * (C * 64 + 64 * 128 + 128 * 1024),
            transcendentals=0,
            bytes_accessed=_nbytes(x_p, w1, b1, w2, b2, w3) + B * 1024 * 4),
    )(x_p, w1, b1, w2, b2, w3)

    # Pre-activation pooled features; conv3 bias + ReLU applied in the FC head.
    g = pooled.reshape(B, 1024)

    vmem = pl.BlockSpec(memory_space=pltpu.MemorySpace.VMEM)
    out9 = pl.pallas_call(
        _fc_head_kernel,
        out_shape=jax.ShapeDtypeStruct((B, 9), jnp.float32),
        in_specs=[vmem] * 8,
        out_specs=vmem,
        cost_estimate=pl.CostEstimate(
            flops=2 * B * (1024 * 512 + 512 * 256 + 256 * 9),
            transcendentals=0,
            bytes_accessed=_nbytes(g, b3, wf1, bf1, wf2, bf2, wf3, bf3) + B * 9 * 4),
    )(g, b3, wf1, bf1, wf2, bf2, wf3, bf3)

    return out9.reshape(B, 3, 3)


# ---------------------------------------------------------------------------
# Pure-JAX reference (same folded params / same bf16 cast points) for checking.
# Mathematically identical to the PyTorch eval-mode forward: the per-channel
# max commutes with the monotone conv3 bias + ReLU.
# ---------------------------------------------------------------------------
def _reference_forward(x, folded_params):
    (w1, b1, w2, b2, w3, b3, wf1, bf1, wf2, bf2, wf3, bf3) = folded_params
    B, C, N = x.shape
    xb = jnp.transpose(x, (0, 2, 1)).reshape(B * N, C).astype(jnp.bfloat16)
    h = jnp.maximum(jnp.dot(xb, w1, preferred_element_type=jnp.float32) + b1, 0.0)
    h = jnp.maximum(jnp.dot(h.astype(jnp.bfloat16), w2,
                            preferred_element_type=jnp.float32) + b2, 0.0)
    h = jnp.dot(h.astype(jnp.bfloat16), w3, preferred_element_type=jnp.float32)
    g = jnp.max(h.astype(jnp.bfloat16).reshape(B, N, 1024), axis=1).astype(jnp.float32)
    g = jnp.maximum(g + b3, 0.0)
    g = jnp.maximum(jnp.dot(g.astype(jnp.bfloat16), wf1,
                            preferred_element_type=jnp.float32) + bf1, 0.0)
    g = jnp.maximum(jnp.dot(g.astype(jnp.bfloat16), wf2,
                            preferred_element_type=jnp.float32) + bf2, 0.0)
    out = jnp.dot(g.astype(jnp.bfloat16), wf3,
                  preferred_element_type=jnp.float32) + bf3   # identity folded in bf3
    return out.reshape(B, 3, 3)


if __name__ == "__main__":
    key = jax.random.PRNGKey(0)
    kx, kp = jax.random.split(key)

    B, POINT_SIZE, N = 2, 3, 16          # small shapes consistent with STN3d
    x = jax.random.normal(kx, (B, POINT_SIZE, N), dtype=jnp.float32)

    raw = init_params(kp, point_size=POINT_SIZE)
    folded = fold_params(raw)

    out = jax.block_until_ready(stn3d_forward(x, folded))
    assert out.shape == (B, 3, 3) and out.dtype == jnp.float32

    ref = jax.block_until_ready(_reference_forward(x, folded))
    assert jnp.allclose(out, ref, rtol=2e-2, atol=2e-2), float(
        jnp.max(jnp.abs(out - ref)))

    print("KERNEL_OK")
</pallas_src>

<mosaic_0001>
module attributes {stable_mosaic.version = 11 : i64} {
  func.func @_point_mlp_max_kernel(%arg0: i32, %arg1: i32, %arg2: memref<1x3x128xbf16, #tpu.memory_space<vmem>>, %arg3: memref<3x64xbf16, #tpu.memory_space<vmem>>, %arg4: memref<1x64xf32, #tpu.memory_space<vmem>>, %arg5: memref<64x128xbf16, #tpu.memory_space<vmem>>, %arg6: memref<1x128xf32, #tpu.memory_space<vmem>>, %arg7: memref<128x1024xbf16, #tpu.memory_space<vmem>>, %arg8: memref<1x1x1024xf32, #tpu.memory_space<vmem>>) attributes {dimension_semantics = [#tpu.dimension_semantics<parallel>, #tpu.dimension_semantics<arbitrary>], iteration_bounds = array<i64: 2, 1>, scalar_prefetch = 0 : i64, scratch_operands = 0 : i64, tpu.core_type = #tpu.core_type<tc>, window_params = [{transform_indices = @transform_0, window_bounds = array<i64: 1, 3, 128>}, {pipeline_mode = #tpu.pipeline_mode<synchronous>, transform_indices = @transform_1, window_bounds = array<i64: 3, 64>}, {pipeline_mode = #tpu.pipeline_mode<synchronous>, transform_indices = @transform_2, window_bounds = array<i64: 1, 64>}, {pipeline_mode = #tpu.pipeline_mode<synchronous>, transform_indices = @transform_3, window_bounds = array<i64: 64, 128>}, {pipeline_mode = #tpu.pipeline_mode<synchronous>, transform_indices = @transform_4, window_bounds = array<i64: 1, 128>}, {pipeline_mode = #tpu.pipeline_mode<synchronous>, transform_indices = @transform_5, window_bounds = array<i64: 128, 1024>}, {transform_indices = @transform_6, window_bounds = array<i64: 1, 1, 1024>}]} {
    %c0 = arith.constant 0 : index
    %c0_0 = arith.constant 0 : index
    %c0_1 = arith.constant 0 : index
    %0 = vector.load %arg2[%c0, %c0_0, %c0_1] : memref<1x3x128xbf16, #tpu.memory_space<vmem>>, vector<1x3x128xbf16>
    %1 = vector.shape_cast %0 : vector<1x3x128xbf16> to vector<3x128xbf16>
    %c0_2 = arith.constant 0 : index
    %c0_3 = arith.constant 0 : index
    %2 = vector.load %arg3[%c0_2, %c0_3] : memref<3x64xbf16, #tpu.memory_space<vmem>>, vector<3x64xbf16>
    %cst = arith.constant dense<0.000000e+00> : vector<128x64xf32>
    %3 = tpu.matmul %1, %2, %cst {dimension_numbers = #tpu.dot_dimension_numbers<[0], [0], [1], [1], [0, 1, 1, 1], [], []>} : vector<3x128xbf16>, vector<3x64xbf16>, vector<128x64xf32> -> vector<128x64xf32>
    %c0_4 = arith.constant 0 : index
    %c0_5 = arith.constant 0 : index
    %4 = vector.load %arg4[%c0_4, %c0_5] : memref<1x64xf32, #tpu.memory_space<vmem>>, vector<1x64xf32>
    %5 = vector.broadcast %4 : vector<1x64xf32> to vector<128x64xf32>
    %6 = arith.addf %3, %5 : vector<128x64xf32>
    %cst_6 = arith.constant 0.000000e+00 : f32
    %7 = vector.broadcast %cst_6 : f32 to vector<128x64xf32>
    %8 = arith.maximumf %6, %7 : vector<128x64xf32>
    %9 = arith.truncf %8 : vector<128x64xf32> to vector<128x64xbf16>
    %c0_7 = arith.constant 0 : index
    %c0_8 = arith.constant 0 : index
    %10 = vector.load %arg5[%c0_7, %c0_8] : memref<64x128xbf16, #tpu.memory_space<vmem>>, vector<64x128xbf16>
    %cst_9 = arith.constant dense<0.000000e+00> : vector<128x128xf32>
    %11 = tpu.matmul %9, %10, %cst_9 {dimension_numbers = #tpu.dot_dimension_numbers<[1], [0], [0], [1], [0, 0, 1, 1], [], []>} : vector<128x64xbf16>, vector<64x128xbf16>, vector<128x128xf32> -> vector<128x128xf32>
    %c0_10 = arith.constant 0 : index
    %c0_11 = arith.constant 0 : index
    %12 = vector.load %arg6[%c0_10, %c0_11] : memref<1x128xf32, #tpu.memory_space<vmem>>, vector<1x128xf32>
    %13 = vector.broadcast %12 : vector<1x128xf32> to vector<128x128xf32>
    %14 = arith.addf %11, %13 : vector<128x128xf32>
    %cst_12 = arith.constant 0.000000e+00 : f32
    %15 = vector.broadcast %cst_12 : f32 to vector<128x128xf32>
    %16 = arith.maximumf %14, %15 : vector<128x128xf32>
    %17 = arith.truncf %16 : vector<128x128xf32> to vector<128x128xbf16>
    %c0_13 = arith.constant 0 : index
    %c0_14 = arith.constant 0 : index
    %18 = vector.load %arg7[%c0_13, %c0_14] : memref<128x1024xbf16, #tpu.memory_space<vmem>>, vector<128x1024xbf16>
    %cst_15 = arith.constant dense<0.000000e+00> : vector<128x1024xf32>
    %19 = tpu.matmul %17, %18, %cst_15 {dimension_numbers = #tpu.dot_dimension_numbers<[1], [0], [0], [1], [0, 0, 1, 1], [], []>} : vector<128x128xbf16>, vector<128x1024xbf16>, vector<128x1024xf32> -> vector<128x1024xf32>
    %20 = arith.truncf %19 : vector<128x1024xf32> to vector<128x1024xbf16>
    %c0_i32 = arith.constant 0 : i32
    %21 = arith.cmpi eq, %arg1, %c0_i32 : i32
    %22 = arith.extui %21 : i1 to i32
    %c0_i32_16 = arith.constant 0 : i32
    %23 = arith.cmpi ne, %22, %c0_i32_16 : i32
    scf.if %23 {
      %cst_24 = arith.constant 0xFF800000 : f32
      %33 = vector.broadcast %cst_24 : f32 to vector<1x1024xf32>
      %c0_25 = arith.constant 0 : index
      %c0_26 = arith.constant 0 : index
      %c0_27 = arith.constant 0 : index
      %34 = vector.load %arg8[%c0_25, %c0_26, %c0_27] : memref<1x1x1024xf32, #tpu.memory_space<vmem>>, vector<1x1x1024xf32>
      %35 = vector.shape_cast %34 : vector<1x1x1024xf32> to vector<1x1024xf32>
      %36 = vector.shape_cast %33 : vector<1x1024xf32> to vector<1x1x1024xf32>
      tpu.vector_store %arg8[%c0_25, %c0_26, %c0_27], %36 {strides = array<i32>} : memref<1x1x1024xf32, #tpu.memory_space<vmem>>, vector<1x1x1024xf32>,
    } else {
    }
    %c0_17 = arith.constant 0 : index
    %c0_18 = arith.constant 0 : index
    %c0_19 = arith.constant 0 : index
    %24 = vector.load %arg8[%c0_17, %c0_18, %c0_19] : memref<1x1x1024xf32, #tpu.memory_space<vmem>>, vector<1x1x1024xf32>
    %25 = vector.shape_cast %24 : vector<1x1x1024xf32> to vector<1x1024xf32>
    %cst_20 = arith.constant dense<0xFF80> : vector<1024xbf16>
    %26 = vector.multi_reduction <maximumf>, %20, %cst_20 [0] : vector<128x1024xbf16> to vector<1024xbf16>
    %27 = vector.shape_cast %26 : vector<1024xbf16> to vector<1x1024xbf16>
    %28 = arith.extf %27 : vector<1x1024xbf16> to vector<1x1024xf32>
    %29 = arith.maximumf %25, %28 : vector<1x1024xf32>
    %c0_21 = arith.constant 0 : index
    %c0_22 = arith.constant 0 : index
    %c0_23 = arith.constant 0 : index
    %30 = vector.load %arg8[%c0_21, %c0_22, %c0_23] : memref<1x1x1024xf32, #tpu.memory_space<vmem>>, vector<1x1x1024xf32>
    %31 = vector.shape_cast %30 : vector<1x1x1024xf32> to vector<1x1024xf32>
    %32 = vector.shape_cast %29 : vector<1x1024xf32> to vector<1x1x1024xf32>
    tpu.vector_store %arg8[%c0_21, %c0_22, %c0_23], %32 {strides = array<i32>} : memref<1x1x1024xf32, #tpu.memory_space<vmem>>, vector<1x1x1024xf32>,
    return
  }
  func.func @transform_0(%arg0: i32, %arg1: i32) -> (i32, i32, i32) {
    %c0_i32 = arith.constant 0 : i32
    %c0_i32_0 = arith.constant 0 : i32
    return %arg0, %c0_i32, %arg1 : i32, i32, i32
  }
  func.func @transform_1(%arg0: i32, %arg1: i32) -> (i32, i32) {
    %c0_i32 = arith.constant 0 : i32
    %c0_i32_0 = arith.constant 0 : i32
    %c0_i32_1 = arith.constant 0 : i32
    return %c0_i32, %c0_i32_0 : i32, i32
  }
  func.func @transform_2(%arg0: i32, %arg1: i32) -> (i32, i32) {
    %c0_i32 = arith.constant 0 : i32
    %c0_i32_0 = arith.constant 0 : i32
    %c0_i32_1 = arith.constant 0 : i32
    return %c0_i32, %c0_i32_0 : i32, i32
  }
  func.func @transform_3(%arg0: i32, %arg1: i32) -> (i32, i32) {
    %c0_i32 = arith.constant 0 : i32
    %c0_i32_0 = arith.constant 0 : i32
    %c0_i32_1 = arith.constant 0 : i32
    return %c0_i32, %c0_i32_0 : i32, i32
  }
  func.func @transform_4(%arg0: i32, %arg1: i32) -> (i32, i32) {
    %c0_i32 = arith.constant 0 : i32
    %c0_i32_0 = arith.constant 0 : i32
    %c0_i32_1 = arith.constant 0 : i32
    return %c0_i32, %c0_i32_0 : i32, i32
  }
  func.func @transform_5(%arg0: i32, %arg1: i32) -> (i32, i32) {
    %c0_i32 = arith.constant 0 : i32
    %c0_i32_0 = arith.constant 0 : i32
    %c0_i32_1 = arith.constant 0 : i32
    return %c0_i32, %c0_i32_0 : i32, i32
  }
  func.func @transform_6(%arg0: i32, %arg1: i32) -> (i32, i32, i32) {
    %c0_i32 = arith.constant 0 : i32
    %c0_i32_0 = arith.constant 0 : i32
    %c0_i32_1 = arith.constant 0 : i32
    return %arg0, %c0_i32, %c0_i32_0 : i32, i32, i32
  }
}

</mosaic_0001>

<bundles_post_ra>
// kernel: tpu_custom_call.1
= control target key start
LH: loop header
LB: loop body
LE: loop exit
PB: predicated region body
PF: predicated region fallthrough
CT: control target
= control target key end

     0   :  { %11 = vsyncpa [#allocation3], 0  ;;  %s2674_s0 = inlined_call_operand.vmem [shape: bf16[2,3,128], index: 0, kind: input, shape index: {}]   ;;  %s2675_s1 = inlined_call_operand.vmem [shape: bf16[3,64], index: 1, kind: input, shape index: {}]   ;;  %s2676_s2 = inlined_call_operand.vmem [shape: f32[1,64], index: 2, kind: input, shape index: {}]   ;;  %s2677_s3 = inlined_call_operand.hbm [shape: bf16[64,128], index: 3, kind: input, shape index: {}]   ;;  %s2678_s4 = inlined_call_operand.vmem [shape: f32[1,128], index: 4, kind: input, shape index: {}]   ;;  %s2679_s5 = inlined_call_operand.hbm [shape: bf16[128,1024], index: 5, kind: input, shape index: {}]   ;;  %s2680_s6 = inlined_call_operand.hbm [shape: f32[2,1,1024], index: 6, kind: output, shape index: {}]  }
   0x1   :  { %12 = vsyncpa [#allocation6], 0 }
   0x2   :  { %13 = vsyncpa [#allocation4], 0 }
   0x3   :  { %15 = vsyncpa [#allocation4 + $0x1], 0  ;;  %s2324_s21 = smov 0   ;;  %s2326_s22 = smov 0  }
   0x4   :  { %s2328_s23 = smov 0   ;;  %s2330_s24 = smov 0  }
   0x5   :  { %s2332_s25 = smov 0   ;;  %s2334_s26 = smov 0  }
   0x6 LB: > { %2687 = sst [smem:[#allocation11_spill]] %s2273_s25  ;;  %s1881_s27 = sadd.s32 4294967295, %s2277_s26   ;;  %s2277_s26 = sphi %s2334_s26, %s21_s26   ;;  %s2273_s25 = sphi %s2332_s25, %s2699_s25   ;;  %s2269_s24 = sphi %s2330_s24, %s2698_s24   ;;  %s2265_s23 = sphi %s2328_s23, %s2702_s23   ;;  %s2261_s22 = sphi %s2326_s22, %s2701_s22   ;;  %s2257_s21 = sphi %s2324_s21, %s2700_s21  }
   0x7   : > { %s1882_s28 = sadd.s32 4294967294, %s2277_s26   ;;  %s33_s29 = sadd.s32 1, %s2273_s25 }
   0x8   : > { %s173_s30 = sadd.s32 1, %s2265_s23  ;;  %p35_p0 = scmp.ge.s32.totalorder %s33_s29, 2 }
   0x9   : > { %p183_p1 = scmp.ne.s32.totalorder %s2265_s23, %s2261_s22  ;;  %p184_p2 = scmp.eq.s32.totalorder %s1881_s27, 1 }
   0xa   : > { %p189_p3 = scmp.ne.s32.totalorder %s2261_s22, %s2257_s21  ;;  %s2704_s29 = smov (%p35_p0, %s33_s29), 0 }
   0xb   : > { %2688 = sst [smem:[#allocation12_spill]] %s2704_s29  ;;  %p2364_p4 = por %p184_p2, %p183_p1 }
   0xc   : > { %p190_p5 = scmp.eq.s32.totalorder %s1882_s28, 1  ;;  %s170_s8 = ssub.s32 %s2273_s25, %s2704_s29 }
   0xd   : > { %s2689_s7 = scalar_select %p2364_p4, 1, 0 }
   0xe   : > { %p1883_p6 = scmp.ge.s32.totalorder %s2277_s26, 1  ;;  %p171_p7 = scmp.eq.s32.totalorder %s170_s8, 0 }
   0xf   : > { %p2371_p8 = por %p190_p5, %p189_p3  ;;  %p197_p9 = scmp.lt.s32.totalorder %s2277_s26, 3 }
  0x10   : > { %s2377_s10 = scalar_select %p171_p7, %s2265_s23, %s173_s30  }
  0x11   : > { %s2690_s9 = scalar_select %p2371_p8, 1, 0 }
  0x12   : > { %p2379_p10 = pnand %p1883_p6, %p197_p9  ;;  %p2383_p11 = scmp.eq.s32.totalorder %s1881_s27, 0 }
  0x13   : > { %s2279_s13 = smov [#allocation2]   ;;  %s2280_s16 = smov [#allocation5]  }
  0x14   : > { %s2691_s11 = scalar_select %p2379_p10, 1, 0 }
  0x15   : > { %s2692_s12 = scalar_select %p2383_p11, 1, 0 }
  0x16   : > { %p2057_p12 = pneg %p2379_p10  ;;  %s215_s14 = sshll.u32 %s2279_s13, 4  ;;  %s216_s14 = int_to_ptr.vmem [resolvable:$true] %s215_s14 }
  0x17   : > { %s231_s17 = sshll.u32 %s2280_s16, 4  ;;  %s2135_s20 = scalar_lea.hbm %s2677_s3, 512  ;;  %s2395_s17 = int_to_ptr.vmem [resolvable:$true] %s231_s17 }
  0x18   : > { %p2391_p13 = pnand %p2383_p11, %p2057_p12  ;;  %p2136_p0 = scmp.ne.s32.totalorder %s2677_s3, %s2135_s20 }
  0x19   : > { %p2142_p5 = scmp.lt.u32.totalorder %s2135_s20, %s2677_s3 }
  0x1a   : > { %p2137_p1 = pneg %p2391_p13 }
  0x1c   : > { %p2138_p2 = pnand %p2137_p1, %p2136_p0 }
  0x1e   : > { %p2139_p3 = pneg %p2138_p2 }
  0x20   : > { %p2144_p6 = pnand %p2142_p5, %p2139_p3 }
  0x22   : > { %2147 = shalt.err (!%p2144_p6)
}
  0x23   : > { %s2148_s13 = scalar_lea.vmem %s216_s14, 512  ;;  %p2156_p8 = scmp.lt.s32.totalorder %s216_s14, %s216_s14 }
  0x24   : > { %p2149_p7 = scmp.ne.s32.totalorder %s216_s14, %s2148_s13  ;;  %p2157_p4 = scmp.lt.s32.totalorder %s2148_s13, %s2148_s13 }
  0x26   : > { %p2151_p9 = pnand %p2149_p7, %p2137_p1  ;;  %p2158_p11 = por %p2157_p4, %p2156_p8 }
  0x28   : > { %p2152_p12 = pneg %p2151_p9 }
  0x2a   : > { %p2159_p10 = pnand %p2158_p11, %p2152_p12 }
  0x2c   : > { %2162 = shalt.err (!%p2159_p10)
}
  0x2d   : > { %s2281_s16 = smov 64   ;;  %s2282_s18 = smov 4  }
  0x2e   : > { %2060 = dma.hbm_to_vmem [thread:$0]  (!%p2391_p13), %s2677_s3, 512, %s216_s14, [#allocation3], %s2281_s16, %s2281_s16, %s2282_s18  }
  0x2f   : > { %s2163_s30 = scalar_lea.hbm %s2679_s5, 8192 }
  0x30   : > { %p2164_p0 = scmp.ne.s32.totalorder %s2679_s5, %s2163_s30  ;;  %p2170_p10 = scmp.lt.u32.totalorder %s2163_s30, %s2679_s5 }
  0x32   : > { %p2166_p4 = pnand %p2164_p0, %p2137_p1 }
  0x34   : > { %p2167_p8 = pneg %p2166_p4 }
  0x36   : > { %p2172_p11 = pnand %p2170_p10, %p2167_p8 }
  0x38   : > { %2175 = shalt.err (!%p2172_p11)
}
  0x39   : > { %s2176_s14 = scalar_lea.vmem %s2395_s17, 8192  ;;  %p2184_p6 = scmp.lt.s32.totalorder %s2395_s17, %s2395_s17 }
  0x3a   : > { %p2177_p2 = scmp.ne.s32.totalorder %s2395_s17, %s2176_s14  ;;  %p2185_p7 = scmp.lt.s32.totalorder %s2176_s14, %s2176_s14 }
  0x3c   : > { %p2179_p3 = pnand %p2177_p2, %p2137_p1  ;;  %p2186_p9 = por %p2185_p7, %p2184_p6 }
  0x3e   : > { %p2180_p5 = pneg %p2179_p3 }
  0x40   : > { %p2187_p12 = pnand %p2186_p9, %p2180_p5 }
  0x42   : > { %2190 = shalt.err (!%p2187_p12)
}
  0x43   : > { %s2283_s25 = smov 512   ;;  %s2284_s29 = smov 32  }
  0x44   : > { %2063 = dma.hbm_to_vmem [thread:$0]  (!%p2391_p13), %s2679_s5, 8192, %s2395_s17, [#allocation6], %s2283_s25, %s2283_s25, %s2284_s29  }
  0x45   : > { %p2694_p0 = scmp.ne.s32.totalorder %s2691_s11, 0 }
  0x46   : > { %p2695_p1 = scmp.ne.s32.totalorder (!%p2694_p0), %s2692_s12, 0 }
  0x47   : > { %257 = sbr.rel (%p2694_p0) target bundleno = 1021 (0x3fd), region = 44 }
  0x4e   : > { %2244 = dma.done.wait (%p2695_p1), [#allocation3], 512  }
  0x4f   : > { %2246 = vsyncadd (%p2695_p1), [#allocation3], 4294966784 }
  0x50   : > { %2248 = dma.done.wait (%p2695_p1), [#allocation6], 8192  }
  0x51   : > { %2250 = vsyncadd (%p2695_p1), [#allocation6], 4294959104  ;;  %p293_p4 = scmp.lt.s32.totalorder %s2269_s24, 1  ;;  %vm351_vm0 = vcmask 1040384   ;;  %vm352_vm1 = vcmask 1041408   ;;  %v2285_v0 = vmov 65535  }
  0x52   : > { %v353_v1 = vsel %vm351_vm0, 4294967295, %v2285_v0  ;;  %v302_v4 = vld [vmem:[%s2675_s1] sm:$0x3]  ;;  %v2132_v7 = vld [vmem:[#allocation2 + $0x8] sm:$0xff]   ;;  %vm326_vm2 = vcmask 23552   ;;  %v2133_v16 = vld [vmem:[#allocation2 + $0x10] sm:$0xff]  }
  0x53   : > { %s294_s15 = scalar_select %p293_p4, %s2269_s24, 1  ;;  %v354_v2 = vsel %vm352_vm1, %v353_v1, 0  ;;  %v2131_v6 = vld [vmem:[#allocation2] sm:$0xff]   ;;  %v2134_v17 = vld [vmem:[#allocation2 + $0x18] sm:$0xff]   ;;  %v2470_v20 = vld [vmem:[#allocation5 + $0x8] sm:$0xff]  ;;  %vm518_vm3 = vcmask 523264  }
  0x54   : > { %v356_v5 = vand.u32 %v354_v2, %v302_v4  ;;  %2023 = vmatprep.subr.bf16.mxu1 %v2131_v6  ;;  %v664_v18 = vld [vmem:[#allocation5] sm:$0xff]  ;;  %v2472_v23 = vld [vmem:[#allocation5 + $0x28] sm:$0xff]  ;;  %s290_s14 = sand.u32 1, %s2261_s22   ;;  %s1983_s29 = sshll.u32 %s2269_s24, 7 }
  0x55   : > { %s1891_s11 = sshll.u32 %s294_s15, 1  ;;  %2024 = vmatpush3.bf16.msra.mxu1 %v2131_v6  ;;  %v668_v19 = vld [vmem:[#allocation5 + $0x20] sm:$0xff]  ;;  %v1916_v26 = vcombine.low %v2470_v20, %v2472_v23  ;;  %v1917_v27 = vcombine.high %v2470_v20, %v2472_v23  ;;  %v673_v59 = vld [vmem:[#allocation5 + $0x48] sm:$0xff]  ;;  %s1890_s25 = sshll.u32 %s290_s14, 3 }
  0x56   : > { %s299_s20 = scalar_lea.vmem %s2674_s0, %s1891_s11  ;;  %2005 = vmatprep.subr.bf16.mxu0 %v356_v5  ;;  %2025 = vmatprep.subr.bf16.mxu1 %v2132_v7  ;;  %v1914_v21 = vcombine.low %v664_v18, %v668_v19  ;;  %v1915_v22 = vcombine.high %v664_v18, %v668_v19  ;;  %v672_v24 = vld [vmem:[#allocation5 + $0x40] sm:$0xff]  ;;  %v677_v60 = vld [vmem:[#allocation5 + $0x68] sm:$0xff]  ;;  %s292_s16 = scalar_lea.vmem [#allocation7], %s1890_s25 }
  0x57   : > { %v301_v3 = vld [vmem:[%s299_s20] sm:$0x3]  ;;  %2006 = vmatpush3.bf16.msra.mxu0 %v356_v5  ;;  %v1925_v2 = vcombine.high %v673_v59, %v677_v60  ;;  %v681_v5 = vld [vmem:[#allocation5 + $0x88] sm:$0xff]  ;;  %s1789_s18 = sshll.u32 %s292_s16, 4  ;;  %s2627_s17 = scalar_lea.hbm %s2680_s6, %s1983_s29  ;;  %s2629_s18 = int_to_ptr.vmem [resolvable:$true] %s1789_s18 }
  0x58   : > { %310 = vxpose.xlu0.c.b16.start.end [1/1] (short) %v301_v3, 128  ;;  %v676_v25 = vld [vmem:[#allocation5 + $0x60] sm:$0xff]  ;;  %1048 = vmatprep.subr.bf16.mxu0 %v1915_v22  ;;  %v685_v6 = vld [vmem:[#allocation5 + $0xa8] sm:$0xff]  ;;  %s1775_s19 = scalar_lea.sflag [#allocation4], %s290_s14  ;;  %s2191_s20 = scalar_lea.vmem %s2629_s18, 128 }
  0x59   : > { %2026 = vmatpush3.bf16.msra.mxu1 %v2132_v7  ;;  %v1923_v28 = vcombine.high %v672_v24, %v676_v25  ;;  %v680_v29 = vld [vmem:[#allocation5 + $0x80] sm:$0xff]  ;;  %v1922_v31 = vcombine.low %v672_v24, %v676_v25  ;;  %v1932_v22 = vcombine.low %v681_v5, %v685_v6  ;;  %p2192_p13 = scmp.ne.s32.totalorder %s2629_s18, %s2191_s20  ;;  %p2696_p8 = scmp.ne.s32.totalorder %s2689_s7, 0 }
  0x5a   : > { %2027 = vmatprep.subr.bf16.mxu1 %v2133_v16  ;;  %v684_v30 = vld [vmem:[#allocation5 + $0xa0] sm:$0xff]  ;;  %s2288_s24 = smov [#allocation7]  }
  0x5b   : > { %v1931_v32 = vcombine.high %v680_v29, %v684_v30  ;;  %v688_v33 = vld [vmem:[#allocation5 + $0xc0] sm:$0xff]  ;;  %v1930_v35 = vcombine.low %v680_v29, %v684_v30  ;;  %p2193_p10 = pnand %p2192_p13, %p2696_p8  ;;  %s2195_s27 = sshll.u32 %s2288_s24, 4  ;;  %s2196_s27 = int_to_ptr.vmem [resolvable:$false] %s2195_s27 }
  0x5c   : > { %v692_v34 = vld [vmem:[#allocation5 + $0xe0] sm:$0xff]  ;;  %s2197_s28 = scalar_lea.vmem %s2196_s27, 256  ;;  %p2198_p2 = scmp.lt.s32.totalorder %s2629_s18, %s2196_s27 }
  0x5d   : > { %2028 = vmatpush3.bf16.msra.mxu1 %v2133_v16  ;;  %v1939_v36 = vcombine.high %v688_v33, %v692_v34  ;;  %v696_v37 = vld [vmem:[#allocation5 + $0x100] sm:$0xff]  ;;  %v1938_v39 = vcombine.low %v688_v33, %v692_v34  ;;  %v689_v16 = vld [vmem:[#allocation5 + $0xc8] sm:$0xff]  ;;  %p2194_p11 = pneg %p2193_p10  ;;  %p2199_p3 = scmp.lt.s32.totalorder %s2197_s28, %s2191_s20 }
  0x5e   : > { %2029 = vmatprep.subr.bf16.mxu1 %v2134_v17  ;;  %v700_v38 = vld [vmem:[#allocation5 + $0x120] sm:$0xff] }
  0x5f   : > { %v1947_v40 = vcombine.high %v696_v37, %v700_v38  ;;  %v704_v41 = vld [vmem:[#allocation5 + $0x140] sm:$0xff]  ;;  %v1946_v43 = vcombine.low %v696_v37, %v700_v38  ;;  %v705_v38 = vld [vmem:[#allocation5 + $0x148] sm:$0xff]  ;;  %p2200_p5 = por %p2199_p3, %p2198_p2 }
  0x60   : > { %v708_v42 = vld [vmem:[#allocation5 + $0x160] sm:$0xff] }
  0x61   : > { %2030 = vmatpush3.bf16.msra.mxu1 %v2134_v17  ;;  %v1955_v44 = vcombine.high %v704_v41, %v708_v42  ;;  %v1954_v45 = vcombine.low %v704_v41, %v708_v42  ;;  %v2481_v46 = vld [vmem:[%s2676_s2] ss:$0 sm:$0xff]  ;;  %v693_v17 = vld [vmem:[#allocation5 + $0xe8] sm:$0xff]  ;;  %p2201_p6 = pnand %p2200_p5, %p2194_p11 }
  0x62   : > { %1161 = vmatprep.subr.bf16.mxu1 %v1917_v27  ;;  %v1941_v27 = vcombine.high %v689_v16, %v693_v17  ;;  %v1940_v34 = vcombine.low %v689_v16, %v693_v17  ;;  %v671_v17 = vld [vmem:[#allocation5 + $0x38] sm:$0xff] }
  0xbe   : > { %v318_v8 = vpop.trf.xlu0 }
  0xbf   : > { %2007 = vmatprep.mubr.msk.bf16.mxu0 %vm326_vm2, %v318_v8 }
  0xc2   : > { %v319_v9 = vpop.trf.xlu0 }
  0xc3   : > { %2008 = vmatmul.mubr.msk.bf16.vlgmr.msra.gmra.mrb[0].mxu0 %vm326_vm2, %v319_v9 }
  0xc4   : > { %1049 = vmatpush1.bf16.msra.mxu0 %v1914_v21 }
  0xc5   : > { %1050 = vmatprep.subr.bf16.mxu0 %v1923_v28  ;;  %v701_v28 = vld [vmem:[#allocation5 + $0x128] sm:$0xff] }
  0xc6   : > { %v320_v10 = vpop.trf.xlu0 }
  0xc7   : > { %2011 = vmatprep.mubr.msk.bf16.mxu0 %vm326_vm2, %v320_v10 }
  0xc8   : > { %1051 = vmatpush1.bf16.msra.mxu0 %v1922_v31 }
  0xc9   : > { %1052 = vmatprep.subr.bf16.mxu0 %v1931_v32 }
  0xca   : > { %v321_v11 = vpop.trf.xlu0 }
  0xcb   : > { %2012 = vmatmul.mubr.msk.bf16.gmra.mrb[4].mxu0 %vm326_vm2, %v321_v11 }
  0xcc   : > { %1053 = vmatpush1.bf16.msra.mxu0 %v1930_v35 }
  0xcd   : > { %1054 = vmatprep.subr.bf16.mxu0 %v1939_v36 }
  0xce   : > { %v322_v12 = vpop.trf.xlu0 }
  0xcf   : > { %2015 = vmatprep.mubr.msk.bf16.mxu0 %vm326_vm2, %v322_v12  ;;  %v1924_v12 = vcombine.low %v673_v59, %v677_v60  ;;  %v712_v60 = vld [vmem:[#allocation5 + $0x180] sm:$0xff] }
  0xd0   : > { %1055 = vmatpush1.bf16.msra.mxu0 %v1938_v39  ;;  %v709_v39 = vld [vmem:[#allocation5 + $0x168] sm:$0xff] }
  0xd1   : > { %1056 = vmatprep.subr.bf16.mxu0 %v1947_v40 }
  0xd2   : > { %v323_v13 = vpop.trf.xlu0 }
  0xd3   : > { %2016 = vmatmul.mubr.msk.bf16.gmra.mrb[8].mxu0 %vm326_vm2, %v323_v13 }
  0xd4   : > { %1057 = vmatpush1.bf16.msra.mxu0 %v1946_v43 }
  0xd5   : > { %1058 = vmatprep.subr.bf16.mxu0 %v1955_v44 }
  0xd6   : > { %v324_v14 = vpop.trf.xlu0 }
  0xd7   : > { %2019 = vmatprep.mubr.msk.bf16.mxu0 %vm326_vm2, %v324_v14  ;;  %v1933_v14 = vcombine.high %v681_v5, %v685_v6  ;;  %v721_v5 = vld [vmem:[#allocation5 + $0x1c8] sm:$0xff] }
  0xd8   : > { %1059 = vmatpush1.bf16.msra.mxu0 %v1954_v45 }
  0xda   : > { %v325_v15 = vpop.trf.xlu0 }
  0xdb   : > { %2020 = vmatmul.mubr.msk.bf16.gmra.mrb[12].mxu0 %vm326_vm2, %v325_v15 }
 0x196   : > { %v2009_v47 = vpop.f32.mrb[0].mxu0 }
 0x197   : > { %v401_v48 = vadd.f32 %v2009_v47, %v2481_v46  ;;  %v392_v49 = vpop.f32.mrb[1].mxu0  ;;  %v1957_v47 = vcombine.high %v705_v38, %v709_v39 }
 0x198   : > { %v393_v50 = vadd.f32 %v2481_v46, %v392_v49  ;;  %v2010_v51 = vpop.f32.mrb[2].mxu0 }
 0x199   : > { %v404_v52 = vadd.f32 %v2010_v51, %v2481_v46  ;;  %v395_v53 = vpop.f32.mrb[3].mxu0  ;;  %v457_v55 = vmax.f32 %v401_v48, 0.0 }
 0x19a   : > { %v396_v54 = vadd.f32 %v2481_v46, %v395_v53  ;;  %v455_v57 = vmax.f32 %v393_v50, 0.0 }
 0x19b   : > { %v458_v56 = vmax.f32 %v404_v52, 0.0 }
 0x19c   : > { %v456_v58 = vmax.f32 %v396_v54, 0.0 }
 0x19d   : > { %v472_v61 = vpack.c.bf16 %v458_v56, %v457_v55  ;;  %v1956_v55 = vcombine.low %v705_v38, %v709_v39 }
 0x19e   : > { %v2013_v62 = vpop.f32.mrb[4].mxu0  ;;  %v471_v63 = vpack.c.bf16 %v456_v58, %v455_v57 }
 0x19f   : > { %v417_v0 = vadd.f32 %v2013_v62, %v2481_v46  ;;  %v408_v1 = vpop.f32.mrb[5].mxu0  ;;  %v713_v62 = vld [vmem:[#allocation5 + $0x188] sm:$0xff] }
 0x1a0   : > { %v409_v3 = vadd.f32 %v2481_v46, %v408_v1  ;;  %2031 = vmatprep.mubr.msk.bf16.mxu1 %vm518_vm3, %v471_v63  ;;  %v2014_v4 = vpop.f32.mrb[6].mxu0 }
 0x1a1   : > { %v461_v7 = vmax.f32 %v417_v0, 0.0  ;;  %v420_v8 = vadd.f32 %v2014_v4, %v2481_v46  ;;  %2032 = vmatmul.mubr.msk.bf16.vlgmr.msra.gmra.mrb[0].mxu1 %vm518_vm3, %v472_v61  ;;  %v411_v9 = vpop.f32.mrb[7].mxu0  ;;  %v716_v61 = vld [vmem:[#allocation5 + $0x1a0] sm:$0xff]  ;;  %v717_v0 = vld [vmem:[#allocation5 + $0x1a8] sm:$0xff] }
 0x1a2   : > { %v459_v10 = vmax.f32 %v409_v3, 0.0  ;;  %v412_v11 = vadd.f32 %v2481_v46, %v411_v9  ;;  %1162 = vmatpush1.bf16.msra.mxu1 %v1916_v26  ;;  %v697_v26 = vld [vmem:[#allocation5 + $0x108] sm:$0xff]  ;;  %v1963_v63 = vcombine.high %v712_v60, %v716_v61  ;;  %v1962_v1 = vcombine.low %v712_v60, %v716_v61  ;;  %v720_v3 = vld [vmem:[#allocation5 + $0x1c0] sm:$0xff]  ;;  %v690_v61 = vld [vmem:[#allocation5 + $0xd0] sm:$0xff] }
 0x1a3   : > { %v462_v13 = vmax.f32 %v420_v8, 0.0  ;;  %1163 = vmatprep.subr.bf16.mxu1 %v1925_v2  ;;  %v1949_v36 = vcombine.high %v697_v26, %v701_v28  ;;  %v1948_v43 = vcombine.low %v697_v26, %v701_v28  ;;  %v1964_v2 = vcombine.low %v713_v62, %v717_v0  ;;  %v724_v4 = vld [vmem:[#allocation5 + $0x1e0] sm:$0xff] }
 0x1a4   : > { %v460_v15 = vmax.f32 %v412_v11, 0.0  ;;  %1060 = vmatprep.subr.bf16.mxu0 %v1963_v63  ;;  %v1971_v6 = vcombine.high %v720_v3, %v724_v4  ;;  %v1970_v8 = vcombine.low %v720_v3, %v724_v4  ;;  %v2286_v11 = vmov 0   ;;  %v694_v63 = vld [vmem:[#allocation5 + $0xf0] sm:$0xff] }
 0x1a5   : > { %v474_v18 = vpack.c.bf16 %v462_v13, %v461_v7  ;;  %1061 = vmatpush1.bf16.msra.mxu0 %v1962_v1  ;;  %v725_v7 = vld [vmem:[#allocation5 + $0x1e8] sm:$0xff]  ;;  %1080 = vmatprep.mubr.bf16.mxu0 %v2286_v11  ;;  %v670_v13 = vld [vmem:[#allocation5 + $0x30] sm:$0xff]  ;;  %v695_v1 = vld [vmem:[#allocation5 + $0xf8] sm:$0xff] }
 0x1a6   : > { %v473_v19 = vpack.c.bf16 %v460_v15, %v459_v10  ;;  %v2017_v21 = vpop.f32.mrb[8].mxu0  ;;  %1164 = vmatpush1.bf16.msra.mxu1 %v1924_v12  ;;  %v1972_v9 = vcombine.low %v721_v5, %v725_v7  ;;  %v1973_v10 = vcombine.high %v721_v5, %v725_v7  ;;  %1062 = vmatprep.subr.bf16.mxu0 %v1971_v6  ;;  %v666_v12 = vld [vmem:[#allocation5 + $0x10] sm:$0xff] }
 0x1a7   : > { %v433_v24 = vadd.f32 %v2017_v21, %v2481_v46  ;;  %v424_v25 = vpop.f32.mrb[9].mxu0  ;;  %1165 = vmatprep.subr.bf16.mxu1 %v1933_v14  ;;  %v667_v14 = vld [vmem:[#allocation5 + $0x18] sm:$0xff]  ;;  %v1918_v15 = vcombine.low %v666_v12, %v670_v13  ;;  %v1919_v16 = vcombine.high %v666_v12, %v670_v13  ;;  %v2515_v21 = vld [vmem:[%s2678_s4] ss:$0 sm:$0xff] }
 0x1a8   : > { %2035 = vmatprep.mubr.msk.bf16.mxu1 %vm518_vm3, %v473_v19  ;;  %v425_v20 = vadd.f32 %v2481_v46, %v424_v25  ;;  %v2018_v23 = vpop.f32.mrb[10].mxu0  ;;  %v1921_v19 = vcombine.high %v667_v14, %v671_v17 }
 0x1a9   : > { %2036 = vmatmul.mubr.msk.bf16.gmra.mrb[4].mxu1 %vm518_vm3, %v474_v18  ;;  %v465_v29 = vmax.f32 %v433_v24, 0.0  ;;  %v436_v30 = vadd.f32 %v2018_v23, %v2481_v46  ;;  %v427_v31 = vpop.f32.mrb[11].mxu0  ;;  %1063 = vmatpush1.bf16.msra.mxu0 %v1970_v8  ;;  %v1920_v18 = vcombine.low %v667_v14, %v671_v17  ;;  %v1943_v8 = vcombine.high %v690_v61, %v694_v63  ;;  %v702_v14 = vld [vmem:[#allocation5 + $0x130] sm:$0xff] }
 0x1aa   : > { %v463_v32 = vmax.f32 %v425_v20, 0.0  ;;  %v428_v33 = vadd.f32 %v2481_v46, %v427_v31  ;;  %1166 = vmatpush1.bf16.msra.mxu1 %v1932_v22  ;;  %1274 = vmatprep.subr.bf16.mxu0 %v1919_v16  ;;  %v674_v31 = vld [vmem:[#allocation5 + $0x50] sm:$0xff]  ;;  %v703_v16 = vld [vmem:[#allocation5 + $0x138] sm:$0xff] }
 0x1ab   : > { %v466_v35 = vmax.f32 %v436_v30, 0.0  ;;  %1167 = vmatprep.subr.bf16.mxu1 %v1941_v27 }
 0x1ac   : > { %v464_v37 = vmax.f32 %v428_v33, 0.0 }
 0x1ad   : > { %v476_v40 = vpack.c.bf16 %v466_v35, %v465_v29  ;;  %v675_v35 = vld [vmem:[#allocation5 + $0x58] sm:$0xff] }
 0x1ae   : > { %v475_v41 = vpack.c.bf16 %v464_v37, %v463_v32  ;;  %v2021_v42 = vpop.f32.mrb[12].mxu0  ;;  %1168 = vmatpush1.bf16.msra.mxu1 %v1940_v34  ;;  %v678_v34 = vld [vmem:[#allocation5 + $0x70] sm:$0xff] }
 0x1af   : > { %v449_v44 = vadd.f32 %v2021_v42, %v2481_v46  ;;  %v440_v45 = vpop.f32.mrb[13].mxu0  ;;  %1169 = vmatprep.subr.bf16.mxu1 %v1949_v36  ;;  %v679_v36 = vld [vmem:[#allocation5 + $0x78] sm:$0xff] }
 0x1b0   : > { %2039 = vmatprep.mubr.msk.bf16.mxu1 %vm518_vm3, %v475_v41  ;;  %v441_v48 = vadd.f32 %v2481_v46, %v440_v45  ;;  %v2022_v49 = vpop.f32.mrb[14].mxu0  ;;  %v686_v45 = vld [vmem:[#allocation5 + $0xb0] sm:$0xff] }
 0x1b1   : > { %2040 = vmatmul.mubr.msk.bf16.gmra.mrb[8].mxu1 %vm518_vm3, %v476_v40  ;;  %v469_v50 = vmax.f32 %v449_v44, 0.0  ;;  %v452_v51 = vadd.f32 %v2022_v49, %v2481_v46  ;;  %v443_v52 = vpop.f32.mrb[15].mxu0  ;;  %v682_v40 = vld [vmem:[#allocation5 + $0x90] sm:$0xff]  ;;  %v1929_v44 = vcombine.high %v675_v35, %v679_v36 }
 0x1b2   : > { %v467_v53 = vmax.f32 %v441_v48, 0.0  ;;  %v444_v54 = vadd.f32 %v2481_v46, %v443_v52  ;;  %1170 = vmatpush1.bf16.msra.mxu1 %v1948_v43  ;;  %v1965_v46 = vcombine.high %v713_v62, %v717_v0  ;;  %v1927_v43 = vcombine.high %v674_v31, %v678_v34  ;;  %v687_v48 = vld [vmem:[#allocation5 + $0xb8] sm:$0xff] }
 0x1b3   : > { %v470_v56 = vmax.f32 %v452_v51, 0.0  ;;  %1171 = vmatprep.subr.bf16.mxu1 %v1957_v47  ;;  %v683_v47 = vld [vmem:[#allocation5 + $0x98] sm:$0xff]  ;;  %v1934_v4 = vcombine.low %v682_v40, %v686_v45 }
 0x1b4   : > { %v468_v57 = vmax.f32 %v444_v54, 0.0  ;;  %v1926_v54 = vcombine.low %v674_v31, %v678_v34  ;;  %v691_v0 = vld [vmem:[#allocation5 + $0xd8] sm:$0xff]  ;;  %v1936_v5 = vcombine.low %v683_v47, %v687_v48 }
 0x1b5   : > { %v478_v58 = vpack.c.bf16 %v470_v56, %v469_v50  ;;  %v707_v31 = vld [vmem:[#allocation5 + $0x158] sm:$0xff] }
 0x1b6   : > { %v477_v59 = vpack.c.bf16 %v468_v57, %v467_v53  ;;  %1172 = vmatpush1.bf16.msra.mxu1 %v1956_v55  ;;  %v1928_v55 = vcombine.low %v675_v35, %v679_v36 }
 0x1b7   : > { %1173 = vmatprep.subr.bf16.mxu1 %v1965_v46 }
 0x1b8   : > { %2043 = vmatprep.mubr.msk.bf16.mxu1 %vm518_vm3, %v477_v59  ;;  %v1937_v59 = vcombine.high %v683_v47, %v687_v48  ;;  %v718_v48 = vld [vmem:[#allocation5 + $0x1b0] sm:$0xff] }
 0x1b9   : > { %2044 = vmatmul.mubr.msk.bf16.gmra.mrb[12].mxu1 %vm518_vm3, %v478_v58  ;;  %v1935_v58 = vcombine.high %v682_v40, %v686_v45 }
 0x1ba   : > { %1174 = vmatpush1.bf16.msra.mxu1 %v1964_v2  ;;  %1193 = vmatprep.mubr.bf16.mxu1 %v2286_v11 }
 0x1bb   : > { %1175 = vmatprep.subr.bf16.mxu1 %v1973_v10  ;;  %v698_v10 = vld [vmem:[#allocation5 + $0x110] sm:$0xff] }
 0x1bc   : > { %v1950_v36 = vcombine.low %v698_v10, %v702_v14 }
 0x1be   : > { %1176 = vmatpush1.bf16.msra.mxu1 %v1972_v9  ;;  %v1945_v9 = vcombine.high %v691_v0, %v695_v1 }
 0x1bf   : > { %1387 = vmatprep.subr.bf16.mxu1 %v1921_v19 }
 0x274   : > { %v2033_v22 = vpop.f32.mrb[0].mxu1 }
 0x275   : > { %v586_v24 = vadd.f32 %v2033_v22, %v2515_v21  ;;  %v577_v25 = vpop.f32.mrb[1].mxu1 }
 0x276   : > { %v578_v27 = vadd.f32 %v2515_v21, %v577_v25  ;;  %v2034_v20 = vpop.f32.mrb[2].mxu1  ;;  %v1942_v25 = vcombine.low %v690_v61, %v694_v63  ;;  %v722_v61 = vld [vmem:[#allocation5 + $0x1d0] sm:$0xff] }
 0x277   : > { %v589_v23 = vadd.f32 %v2034_v20, %v2515_v21  ;;  %v580_v26 = vpop.f32.mrb[3].mxu1  ;;  %v642_v29 = vmax.f32 %v586_v24, 0.0  ;;  %v726_v63 = vld [vmem:[#allocation5 + $0x1f0] sm:$0xff] }
 0x278   : > { %v581_v28 = vadd.f32 %v2515_v21, %v580_v26  ;;  %v640_v32 = vmax.f32 %v578_v27, 0.0  ;;  %v1944_v27 = vcombine.low %v691_v0, %v695_v1  ;;  %v723_v0 = vld [vmem:[#allocation5 + $0x1d8] sm:$0xff] }
 0x279   : > { %v643_v30 = vmax.f32 %v589_v23, 0.0  ;;  %v1951_v23 = vcombine.high %v698_v10, %v702_v14  ;;  %v727_v1 = vld [vmem:[#allocation5 + $0x1f8] sm:$0xff] }
 0x27a   : > { %v641_v33 = vmax.f32 %v581_v28, 0.0  ;;  %v706_v28 = vld [vmem:[#allocation5 + $0x150] sm:$0xff] }
 0x27b   : > { %v2521_v37 = vpack.c.bf16 %v643_v30, %v642_v29  ;;  %v710_v30 = vld [vmem:[#allocation5 + $0x170] sm:$0xff] }
 0x27c   : > { %v2523_v38 = vpack.c.bf16 %v641_v33, %v640_v32  ;;  %v2037_v39 = vpop.f32.mrb[4].mxu1  ;;  %v711_v32 = vld [vmem:[#allocation5 + $0x178] sm:$0xff] }
 0x27d   : > { %v602_v41 = vadd.f32 %v2037_v39, %v2515_v21  ;;  %v593_v42 = vpop.f32.mrb[5].mxu1 }
 0x27e   : > { %v594_v49 = vadd.f32 %v2515_v21, %v593_v42  ;;  %1081 = vmatmul.mubr.bf16.vlgmr.msra.gmra.mrb[16].mxu0 %v2523_v38  ;;  %1194 = vmatmul.mubr.bf16.vlgmr.msra.gmra.mrb[16].mxu1 %v2523_v38  ;;  %v2038_v50 = vpop.f32.mrb[6].mxu1  ;;  %v1959_v42 = vcombine.high %v706_v28, %v710_v30 }
 0x27f   : > { %v646_v51 = vmax.f32 %v602_v41, 0.0  ;;  %1275 = vmatpush1.bf16.msra.mxu0 %v1918_v15  ;;  %1388 = vmatpush1.bf16.msra.mxu1 %v1920_v18  ;;  %v605_v52 = vadd.f32 %v2038_v50, %v2515_v21  ;;  %v596_v53 = vpop.f32.mrb[7].mxu1  ;;  %v699_v15 = vld [vmem:[#allocation5 + $0x118] sm:$0xff] }
 0x280   : > { %v644_v56 = vmax.f32 %v594_v49, 0.0  ;;  %v597_v57 = vadd.f32 %v2515_v21, %v596_v53  ;;  %1090 = vmatprep.mubr.bf16.mxu0 %v2286_v11  ;;  %1203 = vmatprep.mubr.bf16.mxu1 %v2286_v11  ;;  %v1953_v26 = vcombine.high %v699_v15, %v703_v16  ;;  %v1952_v39 = vcombine.low %v699_v15, %v703_v16  ;;  %v715_v49 = vld [vmem:[#allocation5 + $0x198] sm:$0xff] }
 0x281   : > { %v647_v60 = vmax.f32 %v605_v52, 0.0  ;;  %1276 = vmatprep.subr.bf16.mxu0 %v1927_v43  ;;  %1389 = vmatprep.subr.bf16.mxu1 %v1929_v44  ;;  %v1961_v43 = vcombine.high %v707_v31, %v711_v32  ;;  %v714_v44 = vld [vmem:[#allocation5 + $0x190] sm:$0xff]  ;;  %v719_v50 = vld [vmem:[#allocation5 + $0x1b8] sm:$0xff] }
 0x282   : > { %v645_v62 = vmax.f32 %v597_v57, 0.0  ;;  %v1960_v57 = vcombine.low %v707_v31, %v711_v32 }
 0x283   : > { %v2533_v2 = vpack.c.bf16 %v647_v60, %v646_v51  ;;  %1277 = vmatpush1.bf16.msra.mxu0 %v1926_v54  ;;  %1390 = vmatpush1.bf16.msra.mxu1 %v1928_v55  ;;  %v1969_v60 = vcombine.high %v715_v49, %v719_v50 }
 0x284   : > { %v2535_v46 = vpack.c.bf16 %v645_v62, %v644_v56  ;;  %v2041_v3 = vpop.f32.mrb[8].mxu1  ;;  %1278 = vmatprep.subr.bf16.mxu0 %v1935_v58  ;;  %1391 = vmatprep.subr.bf16.mxu1 %v1937_v59  ;;  %v1958_v56 = vcombine.low %v706_v28, %v710_v30  ;;  %v1967_v59 = vcombine.high %v714_v44, %v718_v48 }
 0x285   : > { %v618_v6 = vadd.f32 %v2041_v3, %v2515_v21  ;;  %v609_v7 = vpop.f32.mrb[9].mxu1 }
 0x286   : > { %1091 = vmatmul.mubr.bf16.gmra.mrb[20].mxu0 %v2521_v37  ;;  %1204 = vmatmul.mubr.bf16.gmra.mrb[20].mxu1 %v2521_v37  ;;  %v610_v12 = vadd.f32 %v2515_v21, %v609_v7  ;;  %v2042_v13 = vpop.f32.mrb[10].mxu1  ;;  %v1977_v7 = vcombine.high %v723_v0, %v727_v1 }
 0x287   : > { %v650_v17 = vmax.f32 %v618_v6, 0.0  ;;  %1100 = vmatprep.mubr.bf16.mxu0 %v2286_v11  ;;  %1213 = vmatprep.mubr.bf16.mxu1 %v2286_v11  ;;  %v621_v18 = vadd.f32 %v2042_v13, %v2515_v21  ;;  %v612_v19 = vpop.f32.mrb[11].mxu1  ;;  %v1968_v6 = vcombine.low %v715_v49, %v719_v50 }
 0x288   : > { %v648_v22 = vmax.f32 %v610_v12, 0.0  ;;  %1279 = vmatpush1.bf16.msra.mxu0 %v1934_v4  ;;  %1392 = vmatpush1.bf16.msra.mxu1 %v1936_v5  ;;  %v613_v24 = vadd.f32 %v2515_v21, %v612_v19  ;;  %v1966_v5 = vcombine.low %v714_v44, %v718_v48 }
 0x289   : > { %v651_v20 = vmax.f32 %v621_v18, 0.0  ;;  %1280 = vmatprep.subr.bf16.mxu0 %v1943_v8  ;;  %1393 = vmatprep.subr.bf16.mxu1 %v1945_v9  ;;  %v1974_v8 = vcombine.low %v722_v61, %v726_v63  ;;  %v1976_v9 = vcombine.low %v723_v0, %v727_v1 }
 0x28a   : > { %v649_v29 = vmax.f32 %v613_v24, 0.0 }
 0x28b   : > { %v2545_v33 = vpack.c.bf16 %v651_v20, %v650_v17 }
 0x28c   : > { %v2547_v34 = vpack.c.bf16 %v649_v29, %v648_v22  ;;  %1281 = vmatpush1.bf16.msra.mxu0 %v1942_v25  ;;  %1394 = vmatpush1.bf16.msra.mxu1 %v1944_v27  ;;  %v2045_v35 = vpop.f32.mrb[12].mxu1 }
 0x28d   : > { %v634_v40 = vadd.f32 %v2045_v35, %v2515_v21  ;;  %1282 = vmatprep.subr.bf16.mxu0 %v1951_v23  ;;  %1395 = vmatprep.subr.bf16.mxu1 %v1953_v26  ;;  %v625_v41 = vpop.f32.mrb[13].mxu1 }
 0x28e   : > { %1101 = vmatmul.mubr.bf16.gmra.mrb[24].mxu0 %v2535_v46  ;;  %1214 = vmatmul.mubr.bf16.gmra.mrb[24].mxu1 %v2535_v46  ;;  %v626_v45 = vadd.f32 %v2515_v21, %v625_v41  ;;  %v2046_v47 = vpop.f32.mrb[14].mxu1 }
 0x28f   : > { %1110 = vmatprep.mubr.bf16.mxu0 %v2286_v11  ;;  %1223 = vmatprep.mubr.bf16.mxu1 %v2286_v11  ;;  %v654_v51 = vmax.f32 %v634_v40, 0.0  ;;  %v637_v52 = vadd.f32 %v2046_v47, %v2515_v21  ;;  %v628_v53 = vpop.f32.mrb[15].mxu1 }
 0x290   : > { %v652_v54 = vmax.f32 %v626_v45, 0.0  ;;  %1283 = vmatpush1.bf16.msra.mxu0 %v1950_v36  ;;  %1396 = vmatpush1.bf16.msra.mxu1 %v1952_v39  ;;  %v629_v55 = vadd.f32 %v2515_v21, %v628_v53  ;;  %v1975_v21 = vcombine.high %v722_v61, %v726_v63 }
 0x291   : > { %v655_v58 = vmax.f32 %v637_v52, 0.0  ;;  %1284 = vmatprep.subr.bf16.mxu0 %v1959_v42  ;;  %1397 = vmatprep.subr.bf16.mxu1 %v1961_v43 }
 0x292   : > { %v653_v62 = vmax.f32 %v629_v55, 0.0 }
 0x293   : > { %v2557_v3 = vpack.c.bf16 %v655_v58, %v654_v51 }
 0x294   : > { %v662_v4 = vpack.c.bf16 %v653_v62, %v652_v54  ;;  %1285 = vmatpush1.bf16.msra.mxu0 %v1958_v56  ;;  %1398 = vmatpush1.bf16.msra.mxu1 %v1960_v57 }
 0x295   : > { %1286 = vmatprep.subr.bf16.mxu0 %v1967_v59  ;;  %1399 = vmatprep.subr.bf16.mxu1 %v1969_v60 }
 0x296   : > { %1111 = vmatmul.mubr.bf16.gmra.mrb[28].mxu0 %v2533_v2  ;;  %1224 = vmatmul.mubr.bf16.gmra.mrb[28].mxu1 %v2533_v2 }
 0x297   : > { %1120 = vmatprep.mubr.bf16.mxu0 %v2286_v11  ;;  %1233 = vmatprep.mubr.bf16.mxu1 %v2286_v11 }
 0x298   : > { %1287 = vmatpush1.bf16.msra.mxu0 %v1966_v5  ;;  %1400 = vmatpush1.bf16.msra.mxu1 %v1968_v6 }
 0x299   : > { %1288 = vmatprep.subr.bf16.mxu0 %v1975_v21  ;;  %1401 = vmatprep.subr.bf16.mxu1 %v1977_v7 }
 0x29c   : > { %1289 = vmatpush1.bf16.msra.mxu0 %v1974_v8  ;;  %1402 = vmatpush1.bf16.msra.mxu1 %v1976_v9 }
 0x29e   : > { %1121 = vmatmul.mubr.bf16.gmra.mrb[32].mxu0 %v2547_v34  ;;  %1234 = vmatmul.mubr.bf16.gmra.mrb[32].mxu1 %v2547_v34 }
 0x29f   : > { %1130 = vmatprep.mubr.bf16.mxu0 %v2286_v11  ;;  %1243 = vmatprep.mubr.bf16.mxu1 %v2286_v11 }
 0x2a6   : > { %1131 = vmatmul.mubr.bf16.gmra.mrb[36].mxu0 %v2545_v33  ;;  %1244 = vmatmul.mubr.bf16.gmra.mrb[36].mxu1 %v2545_v33 }
 0x2a7   : > { %1140 = vmatprep.mubr.bf16.mxu0 %v2286_v11  ;;  %1253 = vmatprep.mubr.bf16.mxu1 %v2286_v11 }
 0x2ae   : > { %1141 = vmatmul.mubr.bf16.gmra.mrb[40].mxu0 %v662_v4  ;;  %1254 = vmatmul.mubr.bf16.gmra.mrb[40].mxu1 %v662_v4 }
 0x2af   : > { %1150 = vmatprep.mubr.bf16.mxu0 %v2286_v11  ;;  %1263 = vmatprep.mubr.bf16.mxu1 %v2286_v11 }
 0x2b6   : > { %1151 = vmatmul.mubr.bf16.gmra.mrb[44].mxu0 %v2557_v3  ;;  %1264 = vmatmul.mubr.bf16.gmra.mrb[44].mxu1 %v2557_v3 }
 0x2b7   : > { %1306 = vmatprep.mubr.bf16.mxu0 %v2286_v11  ;;  %1419 = vmatprep.mubr.bf16.mxu1 %v2286_v11 }
 0x2be   : > { %1307 = vmatmul.mubr.bf16.vlgmr.msra.gmra.mrb[48].mxu0 %v2523_v38  ;;  %1420 = vmatmul.mubr.bf16.vlgmr.msra.gmra.mrb[48].mxu1 %v2523_v38 }
 0x2bf   : > { %1316 = vmatprep.mubr.bf16.mxu0 %v2286_v11  ;;  %1429 = vmatprep.mubr.bf16.mxu1 %v2286_v11 }
 0x2c6   : > { %1317 = vmatmul.mubr.bf16.gmra.mrb[52].mxu0 %v2521_v37  ;;  %1430 = vmatmul.mubr.bf16.gmra.mrb[52].mxu1 %v2521_v37 }
 0x2c7   : > { %1326 = vmatprep.mubr.bf16.mxu0 %v2286_v11  ;;  %1439 = vmatprep.mubr.bf16.mxu1 %v2286_v11 }
 0x2ce   : > { %1327 = vmatmul.mubr.bf16.gmra.mrb[56].mxu0 %v2535_v46  ;;  %1440 = vmatmul.mubr.bf16.gmra.mrb[56].mxu1 %v2535_v46 }
 0x2cf   : > { %1336 = vmatprep.mubr.bf16.mxu0 %v2286_v11  ;;  %1449 = vmatprep.mubr.bf16.mxu1 %v2286_v11 }
 0x2d6   : > { %1337 = vmatmul.mubr.bf16.gmra.mrb[60].mxu0 %v2533_v2  ;;  %1450 = vmatmul.mubr.bf16.gmra.mrb[60].mxu1 %v2533_v2 }
 0x2d7   : > { %1346 = vmatprep.mubr.bf16.mxu0 %v2286_v11  ;;  %1459 = vmatprep.mubr.bf16.mxu1 %v2286_v11 }
 0x2de   : > { %1347 = vmatmul.mubr.bf16.gmra.mrb[64].mxu0 %v2547_v34  ;;  %1460 = vmatmul.mubr.bf16.gmra.mrb[64].mxu1 %v2547_v34 }
 0x2df   : > { %1356 = vmatprep.mubr.bf16.mxu0 %v2286_v11  ;;  %1469 = vmatprep.mubr.bf16.mxu1 %v2286_v11 }
 0x2e6   : > { %1357 = vmatmul.mubr.bf16.gmra.mrb[68].mxu0 %v2545_v33  ;;  %1470 = vmatmul.mubr.bf16.gmra.mrb[68].mxu1 %v2545_v33 }
 0x2e7   : > { %1366 = vmatprep.mubr.bf16.mxu0 %v2286_v11  ;;  %1479 = vmatprep.mubr.bf16.mxu1 %v2286_v11 }
 0x2ee   : > { %1367 = vmatmul.mubr.bf16.gmra.mrb[72].mxu0 %v662_v4  ;;  %1480 = vmatmul.mubr.bf16.gmra.mrb[72].mxu1 %v662_v4 }
 0x2ef   : > { %1376 = vmatprep.mubr.bf16.mxu0 %v2286_v11  ;;  %1489 = vmatprep.mubr.bf16.mxu1 %v2286_v11 }
 0x2f6   : > { %1377 = vmatmul.mubr.bf16.gmra.mrb[76].mxu0 %v2557_v3  ;;  %1490 = vmatmul.mubr.bf16.gmra.mrb[76].mxu1 %v2557_v3 }
 0x351   : > { %v1082_v37 = vpop.f32.mrb[16].mxu0  ;;  %v1195_v38 = vpop.f32.mrb[16].mxu1 }
 0x352   : > { %v1084_v2 = vpop.f32.mrb[17].mxu0  ;;  %v1197_v46 = vpop.f32.mrb[17].mxu1 }
 0x353   : > { %v1086_v10 = vpop.f32.mrb[18].mxu0  ;;  %v1199_v12 = vpop.f32.mrb[18].mxu1 }
 0x354   : > { %v1500_v13 = vpack.c.bf16 %v1086_v10, %v1082_v37  ;;  %v1502_v14 = vpack.c.bf16 %v1199_v12, %v1195_v38  ;;  %v1088_v15 = vpop.f32.mrb[19].mxu0  ;;  %v1201_v16 = vpop.f32.mrb[19].mxu1 }
 0x355   : > { %v1501_v17 = vpack.c.bf16 %v1088_v15, %v1084_v2  ;;  %v1503_v18 = vpack.c.bf16 %v1201_v16, %v1197_v46 }
 0x359   : > { %v1092_v19 = vpop.f32.mrb[20].mxu0  ;;  %v1205_v22 = vpop.f32.mrb[20].mxu1 }
 0x35a   : > { %v1094_v24 = vpop.f32.mrb[21].mxu0  ;;  %v1207_v11 = vpop.f32.mrb[21].mxu1 }
 0x35b   : > { %v1096_v25 = vpop.f32.mrb[22].mxu0  ;;  %v1209_v27 = vpop.f32.mrb[22].mxu1 }
 0x35c   : > { %v1508_v20 = vpack.c.bf16 %v1096_v25, %v1092_v19  ;;  %v1510_v23 = vpack.c.bf16 %v1209_v27, %v1205_v22  ;;  %v1098_v26 = vpop.f32.mrb[23].mxu0  ;;  %v1211_v28 = vpop.f32.mrb[23].mxu1 }
 0x35d   : > { %v1509_v29 = vpack.c.bf16 %v1098_v26, %v1094_v24  ;;  %v1511_v30 = vpack.c.bf16 %v1211_v28, %v1207_v11 }
 0x35e   : > { %v1570_v31 = vmax.bf16 %v1508_v20, %v1500_v13  ;;  %v1604_v32 = vmax.bf16 %v1510_v23, %v1502_v14 }
 0x35f   : > { %v1587_v33 = vmax.bf16 %v1509_v29, %v1501_v17  ;;  %v1621_v34 = vmax.bf16 %v1511_v30, %v1503_v18 }
 0x361   : > { %v1102_v35 = vpop.f32.mrb[24].mxu0  ;;  %v1215_v36 = vpop.f32.mrb[24].mxu1 }
 0x362   : > { %v1104_v39 = vpop.f32.mrb[25].mxu0  ;;  %v1217_v40 = vpop.f32.mrb[25].mxu1 }
 0x363   : > { %v1106_v41 = vpop.f32.mrb[26].mxu0  ;;  %v1219_v42 = vpop.f32.mrb[26].mxu1 }
 0x364   : > { %v1516_v43 = vpack.c.bf16 %v1106_v41, %v1102_v35  ;;  %v1518_v44 = vpack.c.bf16 %v1219_v42, %v1215_v36  ;;  %v1108_v45 = vpop.f32.mrb[27].mxu0  ;;  %v1221_v47 = vpop.f32.mrb[27].mxu1 }
 0x365   : > { %v1517_v48 = vpack.c.bf16 %v1108_v45, %v1104_v39  ;;  %v1519_v49 = vpack.c.bf16 %v1221_v47, %v1217_v40 }
 0x366   : > { %v1571_v50 = vmax.bf16 %v1570_v31, %v1516_v43  ;;  %v1605_v51 = vmax.bf16 %v1604_v32, %v1518_v44 }
 0x367   : > { %v1588_v52 = vmax.bf16 %v1587_v33, %v1517_v48  ;;  %v1622_v53 = vmax.bf16 %v1621_v34, %v1519_v49 }
 0x369   : > { %v1112_v54 = vpop.f32.mrb[28].mxu0  ;;  %v1225_v55 = vpop.f32.mrb[28].mxu1 }
 0x36a   : > { %v1114_v56 = vpop.f32.mrb[29].mxu0  ;;  %v1227_v57 = vpop.f32.mrb[29].mxu1 }
 0x36b   : > { %v1116_v58 = vpop.f32.mrb[30].mxu0  ;;  %v1229_v59 = vpop.f32.mrb[30].mxu1 }
 0x36c   : > { %v1524_v60 = vpack.c.bf16 %v1116_v58, %v1112_v54  ;;  %v1526_v61 = vpack.c.bf16 %v1229_v59, %v1225_v55  ;;  %v1118_v62 = vpop.f32.mrb[31].mxu0  ;;  %v1231_v63 = vpop.f32.mrb[31].mxu1 }
 0x36d   : > { %v1525_v0 = vpack.c.bf16 %v1118_v62, %v1114_v56  ;;  %v1527_v1 = vpack.c.bf16 %v1231_v63, %v1227_v57 }
 0x36e   : > { %v1572_v3 = vmax.bf16 %v1571_v50, %v1524_v60  ;;  %v1606_v4 = vmax.bf16 %v1605_v51, %v1526_v61 }
 0x36f   : > { %v1589_v5 = vmax.bf16 %v1588_v52, %v1525_v0  ;;  %v1623_v6 = vmax.bf16 %v1622_v53, %v1527_v1 }
 0x371   : > { %v1122_v21 = vpop.f32.mrb[32].mxu0  ;;  %v1235_v7 = vpop.f32.mrb[32].mxu1 }
 0x372   : > { %v1124_v8 = vpop.f32.mrb[33].mxu0  ;;  %v1237_v9 = vpop.f32.mrb[33].mxu1 }
 0x373   : > { %v1126_v37 = vpop.f32.mrb[34].mxu0  ;;  %v1239_v38 = vpop.f32.mrb[34].mxu1 }
 0x374   : > { %v1532_v2 = vpack.c.bf16 %v1126_v37, %v1122_v21  ;;  %v1534_v46 = vpack.c.bf16 %v1239_v38, %v1235_v7  ;;  %v1128_v10 = vpop.f32.mrb[35].mxu0  ;;  %v1241_v12 = vpop.f32.mrb[35].mxu1 }
 0x375   : > { %v1533_v13 = vpack.c.bf16 %v1128_v10, %v1124_v8  ;;  %v1535_v14 = vpack.c.bf16 %v1241_v12, %v1237_v9 }
 0x376   : > { %v1573_v15 = vmax.bf16 %v1572_v3, %v1532_v2  ;;  %v1607_v16 = vmax.bf16 %v1606_v4, %v1534_v46 }
 0x377   : > { %v1590_v17 = vmax.bf16 %v1589_v5, %v1533_v13  ;;  %v1624_v18 = vmax.bf16 %v1623_v6, %v1535_v14 }
 0x379   : > { %v1132_v19 = vpop.f32.mrb[36].mxu0  ;;  %v1245_v22 = vpop.f32.mrb[36].mxu1 }
 0x37a   : > { %v1134_v24 = vpop.f32.mrb[37].mxu0  ;;  %v1247_v11 = vpop.f32.mrb[37].mxu1 }
 0x37b   : > { %v1136_v25 = vpop.f32.mrb[38].mxu0  ;;  %v1249_v27 = vpop.f32.mrb[38].mxu1 }
 0x37c   : > { %v1540_v20 = vpack.c.bf16 %v1136_v25, %v1132_v19  ;;  %v1542_v23 = vpack.c.bf16 %v1249_v27, %v1245_v22  ;;  %v1138_v26 = vpop.f32.mrb[39].mxu0  ;;  %v1251_v28 = vpop.f32.mrb[39].mxu1 }
 0x37d   : > { %v1541_v29 = vpack.c.bf16 %v1138_v26, %v1134_v24  ;;  %v1543_v30 = vpack.c.bf16 %v1251_v28, %v1247_v11 }
 0x37e   : > { %v1574_v31 = vmax.bf16 %v1573_v15, %v1540_v20  ;;  %v1608_v32 = vmax.bf16 %v1607_v16, %v1542_v23 }
 0x37f   : > { %v1591_v33 = vmax.bf16 %v1590_v17, %v1541_v29  ;;  %v1625_v34 = vmax.bf16 %v1624_v18, %v1543_v30 }
 0x381   : > { %v1142_v35 = vpop.f32.mrb[40].mxu0  ;;  %v1255_v36 = vpop.f32.mrb[40].mxu1 }
 0x382   : > { %v1144_v39 = vpop.f32.mrb[41].mxu0  ;;  %v1257_v40 = vpop.f32.mrb[41].mxu1 }
 0x383   : > { %v1146_v41 = vpop.f32.mrb[42].mxu0  ;;  %v1259_v42 = vpop.f32.mrb[42].mxu1 }
 0x384   : > { %v1548_v43 = vpack.c.bf16 %v1146_v41, %v1142_v35  ;;  %v1550_v44 = vpack.c.bf16 %v1259_v42, %v1255_v36  ;;  %v1148_v45 = vpop.f32.mrb[43].mxu0  ;;  %v1261_v47 = vpop.f32.mrb[43].mxu1  ;;  %v1729_v36 = vlaneseq }
 0x385   : > { %v1549_v48 = vpack.c.bf16 %v1148_v45, %v1144_v39  ;;  %v1551_v49 = vpack.c.bf16 %v1261_v47, %v1257_v40 }
 0x386   : > { %v1575_v50 = vmax.bf16 %v1574_v31, %v1548_v43  ;;  %v1609_v51 = vmax.bf16 %v1608_v32, %v1550_v44 }
 0x387   : > { %v1592_v52 = vmax.bf16 %v1591_v33, %v1549_v48  ;;  %v1626_v53 = vmax.bf16 %v1625_v34, %v1551_v49  ;;  %v2287_v34 = vmov 1966171168  }
 0x388   : > { %v1727_v35 = vunpack.c.l.s4 %v2287_v34 }
 0x389   : > { %v1152_v54 = vpop.f32.mrb[44].mxu0  ;;  %v1265_v55 = vpop.f32.mrb[44].mxu1 }
 0x38a   : > { %v1154_v56 = vpop.f32.mrb[45].mxu0  ;;  %v1267_v57 = vpop.f32.mrb[45].mxu1 }
 0x38b   : > { %v1156_v58 = vpop.f32.mrb[46].mxu0  ;;  %v1269_v59 = vpop.f32.mrb[46].mxu1 }
 0x38c   : > { %v1556_v60 = vpack.c.bf16 %v1156_v58, %v1152_v54  ;;  %v1558_v61 = vpack.c.bf16 %v1269_v59, %v1265_v55  ;;  %v1158_v62 = vpop.f32.mrb[47].mxu0  ;;  %v1271_v63 = vpop.f32.mrb[47].mxu1 }
 0x38d   : > { %v1557_v0 = vpack.c.bf16 %v1158_v62, %v1154_v56  ;;  %v1559_v1 = vpack.c.bf16 %v1271_v63, %v1267_v57 }
 0x38e   : > { %v1576_v3 = vmax.bf16 %v1575_v50, %v1556_v60  ;;  %v1610_v4 = vmax.bf16 %v1609_v51, %v1558_v61 }
 0x38f   : > { %v1593_v5 = vmax.bf16 %v1592_v52, %v1557_v0  ;;  %v1627_v6 = vmax.bf16 %v1626_v53, %v1559_v1  ;;  %v1728_v52 = vunpack.c.0.s8 %v1727_v35  ;;  %v1730_v53 = vshrl.u32 %v1729_v36, 7 }
 0x390   : > { %v1577_v21 = vunpack.i.l.bf16 %v1576_v3  ;;  %v1578_v7 = vunpack.i.h.bf16 %v1576_v3  ;;  %v1611_v8 = vunpack.i.l.bf16 %v1610_v4  ;;  %v1612_v9 = vunpack.i.h.bf16 %v1610_v4 }
 0x391   : > { %v1594_v37 = vunpack.i.l.bf16 %v1593_v5  ;;  %v1595_v38 = vunpack.i.h.bf16 %v1593_v5  ;;  %v1628_v2 = vunpack.i.l.bf16 %v1627_v6  ;;  %v1629_v46 = vunpack.i.h.bf16 %v1627_v6  ;;  %v1308_v10 = vpop.f32.mrb[48].mxu0  ;;  %v1421_v12 = vpop.f32.mrb[48].mxu1 }
 0x392   : > { %v1579_v13 = vmax.f32 %v1577_v21, %v1578_v7  ;;  %v1613_v14 = vmax.f32 %v1611_v8, %v1612_v9  ;;  %v1310_v15 = vpop.f32.mrb[49].mxu0  ;;  %v1423_v16 = vpop.f32.mrb[49].mxu1 }
 0x393   : > { %v1596_v17 = vmax.f32 %v1594_v37, %v1595_v38  ;;  %v1630_v18 = vmax.f32 %v1628_v2, %v1629_v46  ;;  %v1312_v19 = vpop.f32.mrb[50].mxu0  ;;  %v1425_v22 = vpop.f32.mrb[50].mxu1 }
 0x394   : > { %v1580_v24 = vrot.slane %v1579_v13, 4  ;;  %v1614_v11 = vrot.slane %v1613_v14, 4  ;;  %v1504_v25 = vpack.c.bf16 %v1312_v19, %v1308_v10  ;;  %v1506_v27 = vpack.c.bf16 %v1425_v22, %v1421_v12  ;;  %v1314_v20 = vpop.f32.mrb[51].mxu0  ;;  %v1427_v23 = vpop.f32.mrb[51].mxu1 }
 0x395   : > { %v1597_v26 = vrot.slane %v1596_v17, 4  ;;  %v1631_v28 = vrot.slane %v1630_v18, 4  ;;  %v1505_v29 = vpack.c.bf16 %v1314_v20, %v1310_v15  ;;  %v1507_v30 = vpack.c.bf16 %v1427_v23, %v1423_v16 }
 0x396   : > { %v1581_v31 = vmax.f32 %v1579_v13, %v1580_v24  ;;  %v1615_v32 = vmax.f32 %v1613_v14, %v1614_v11  ;;  %v2605_v19 = vsub.s32 %v1728_v52, %v1730_v53 }
 0x397   : > { %v1598_v33 = vmax.f32 %v1596_v17, %v1597_v26  ;;  %v1632_v39 = vmax.f32 %v1630_v18, %v1631_v28 }
 0x398   : > { %v1582_v40 = vrot.slane %v1581_v31, 2  ;;  %v1616_v41 = vrot.slane %v1615_v32, 2 }
 0x399   : > { %v1599_v42 = vrot.slane %v1598_v33, 2  ;;  %v1633_v43 = vrot.slane %v1632_v39, 2  ;;  %v1318_v44 = vpop.f32.mrb[52].mxu0  ;;  %v1431_v45 = vpop.f32.mrb[52].mxu1 }
 0x39a   : > { %v1583_v47 = vmax.f32 %v1581_v31, %v1582_v40  ;;  %v1617_v48 = vmax.f32 %v1615_v32, %v1616_v41  ;;  %v1320_v49 = vpop.f32.mrb[53].mxu0  ;;  %v1433_v50 = vpop.f32.mrb[53].mxu1 }
 0x39b   : > { %v1600_v51 = vmax.f32 %v1598_v33, %v1599_v42  ;;  %v1634_v54 = vmax.f32 %v1632_v39, %v1633_v43  ;;  %v1322_v55 = vpop.f32.mrb[54].mxu0  ;;  %v1435_v56 = vpop.f32.mrb[54].mxu1 }
 0x39c   : > { %v1584_v57 = vrot.slane %v1583_v47, 1  ;;  %v1618_v58 = vrot.slane %v1617_v48, 1  ;;  %v1512_v59 = vpack.c.bf16 %v1322_v55, %v1318_v44  ;;  %v1514_v60 = vpack.c.bf16 %v1435_v56, %v1431_v45  ;;  %v1324_v61 = vpop.f32.mrb[55].mxu0  ;;  %v1437_v62 = vpop.f32.mrb[55].mxu1 }
 0x39d   : > { %v1601_v63 = vrot.slane %v1600_v51, 1  ;;  %v1635_v0 = vrot.slane %v1634_v54, 1  ;;  %v1513_v1 = vpack.c.bf16 %v1324_v61, %v1320_v49  ;;  %v1515_v3 = vpack.c.bf16 %v1437_v62, %v1433_v50 }
 0x39e   : > { %v1585_v4 = vmax.f32 %v1583_v47, %v1584_v57  ;;  %v1619_v5 = vmax.f32 %v1617_v48, %v1618_v58  ;;  %v1638_v6 = vmax.bf16 %v1512_v59, %v1504_v25  ;;  %v1672_v21 = vmax.bf16 %v1514_v60, %v1506_v27 }
 0x39f   : > { %v1602_v7 = vmax.f32 %v1600_v51, %v1601_v63  ;;  %v1636_v8 = vmax.f32 %v1634_v54, %v1635_v0  ;;  %v1655_v9 = vmax.bf16 %v1513_v1, %v1505_v29  ;;  %v1689_v37 = vmax.bf16 %v1515_v3, %v1507_v30 }
 0x3a0   : > { %v1586_v38 = vpack.i.bf16 %v1585_v4, %v1585_v4  ;;  %v1620_v2 = vpack.i.bf16 %v1619_v5, %v1619_v5 }
 0x3a1   : > { %v1603_v46 = vpack.i.bf16 %v1602_v7, %v1602_v7  ;;  %v1637_v10 = vpack.i.bf16 %v1636_v8, %v1636_v8  ;;  %v1328_v12 = vpop.f32.mrb[56].mxu0  ;;  %v1441_v13 = vpop.f32.mrb[56].mxu1 }
 0x3a2   : > { %v1706_v14 = vunpack.c.l.bf16 %v1586_v38  ;;  %v1708_v15 = vunpack.c.l.bf16 %v1620_v2  ;;  %v1330_v16 = vpop.f32.mrb[57].mxu0  ;;  %v1443_v17 = vpop.f32.mrb[57].mxu1 }
 0x3a3   : > { %v1707_v18 = vunpack.c.l.bf16 %v1603_v46  ;;  %v1709_v22 = vunpack.c.l.bf16 %v1637_v10  ;;  %v1332_v24 = vpop.f32.mrb[58].mxu0  ;;  %v1445_v11 = vpop.f32.mrb[58].mxu1 }
 0x3a4   : > { %v1520_v25 = vpack.c.bf16 %v1332_v24, %v1328_v12  ;;  %v1522_v27 = vpack.c.bf16 %v1445_v11, %v1441_v13  ;;  %v1334_v20 = vpop.f32.mrb[59].mxu0  ;;  %v1447_v23 = vpop.f32.mrb[59].mxu1 }
 0x3a5   : > { %v1722_v26 = vcombine.low %v1706_v14, %v1707_v18  ;;  %v1723_v28 = vcombine.low %v1708_v15, %v1709_v22  ;;  %v1521_v29 = vpack.c.bf16 %v1334_v20, %v1330_v16  ;;  %v1523_v30 = vpack.c.bf16 %v1447_v23, %v1443_v17 }
 0x3a6   : > { %v1639_v31 = vmax.bf16 %v1638_v6, %v1520_v25  ;;  %v1673_v32 = vmax.bf16 %v1672_v21, %v1522_v27 }
 0x3a7   : > { %v2608_v33 = vrot.slane %v1722_v26, %v2605_v19  ;;  %v2611_v34 = vrot.slane %v1723_v28, %v2605_v19  ;;  %v1656_v35 = vmax.bf16 %v1655_v9, %v1521_v29  ;;  %v1690_v36 = vmax.bf16 %v1689_v37, %v1523_v30 }
 0x3a9   : > { %v1338_v39 = vpop.f32.mrb[60].mxu0  ;;  %v1451_v40 = vpop.f32.mrb[60].mxu1  ;;  %v1754_v41 = vcombine.low %v2608_v33, %v2611_v34 }
 0x3aa   : > { %v1340_v42 = vpop.f32.mrb[61].mxu0  ;;  %v1453_v43 = vpop.f32.mrb[61].mxu1 }
 0x3ab   : > { %v1342_v44 = vpop.f32.mrb[62].mxu0  ;;  %v1455_v45 = vpop.f32.mrb[62].mxu1 }
 0x3ac   : > { %v1528_v47 = vpack.c.bf16 %v1342_v44, %v1338_v39  ;;  %v1530_v48 = vpack.c.bf16 %v1455_v45, %v1451_v40  ;;  %v1344_v49 = vpop.f32.mrb[63].mxu0  ;;  %v1457_v50 = vpop.f32.mrb[63].mxu1 }
 0x3ad   : > { %v1529_v51 = vpack.c.bf16 %v1344_v49, %v1340_v42  ;;  %v1531_v52 = vpack.c.bf16 %v1457_v50, %v1453_v43 }
 0x3ae   : > { %v1640_v53 = vmax.bf16 %v1639_v31, %v1528_v47  ;;  %v1674_v54 = vmax.bf16 %v1673_v32, %v1530_v48 }
 0x3af   : > { %v1657_v55 = vmax.bf16 %v1656_v35, %v1529_v51  ;;  %v1691_v56 = vmax.bf16 %v1690_v36, %v1531_v52 }
 0x3b1   : > { %v1348_v57 = vpop.f32.mrb[64].mxu0  ;;  %v1461_v58 = vpop.f32.mrb[64].mxu1 }
 0x3b2   : > { %v1350_v59 = vpop.f32.mrb[65].mxu0  ;;  %v1463_v60 = vpop.f32.mrb[65].mxu1 }
 0x3b3   : > { %v1352_v61 = vpop.f32.mrb[66].mxu0  ;;  %v1465_v62 = vpop.f32.mrb[66].mxu1 }
 0x3b4   : > { %v1536_v63 = vpack.c.bf16 %v1352_v61, %v1348_v57  ;;  %v1538_v0 = vpack.c.bf16 %v1465_v62, %v1461_v58  ;;  %v1354_v1 = vpop.f32.mrb[67].mxu0  ;;  %v1467_v3 = vpop.f32.mrb[67].mxu1 }
 0x3b5   : > { %v1537_v4 = vpack.c.bf16 %v1354_v1, %v1350_v59  ;;  %v1539_v5 = vpack.c.bf16 %v1467_v3, %v1463_v60 }
 0x3b6   : > { %v1641_v6 = vmax.bf16 %v1640_v53, %v1536_v63  ;;  %v1675_v21 = vmax.bf16 %v1674_v54, %v1538_v0 }
 0x3b7   : > { %v1658_v7 = vmax.bf16 %v1657_v55, %v1537_v4  ;;  %v1692_v8 = vmax.bf16 %v1691_v56, %v1539_v5 }
 0x3b9   : > { %v1358_v9 = vpop.f32.mrb[68].mxu0  ;;  %v1471_v37 = vpop.f32.mrb[68].mxu1 }
 0x3ba   : > { %v1360_v38 = vpop.f32.mrb[69].mxu0  ;;  %v1473_v2 = vpop.f32.mrb[69].mxu1 }
 0x3bb   : > { %v1362_v46 = vpop.f32.mrb[70].mxu0  ;;  %v1475_v10 = vpop.f32.mrb[70].mxu1 }
 0x3bc   : > { %v1544_v12 = vpack.c.bf16 %v1362_v46, %v1358_v9  ;;  %v1546_v13 = vpack.c.bf16 %v1475_v10, %v1471_v37  ;;  %v1364_v14 = vpop.f32.mrb[71].mxu0  ;;  %v1477_v15 = vpop.f32.mrb[71].mxu1 }
 0x3bd   : > { %v1545_v16 = vpack.c.bf16 %v1364_v14, %v1360_v38  ;;  %v1547_v17 = vpack.c.bf16 %v1477_v15, %v1473_v2 }
 0x3be   : > { %v1642_v18 = vmax.bf16 %v1641_v6, %v1544_v12  ;;  %v1676_v22 = vmax.bf16 %v1675_v21, %v1546_v13 }
 0x3bf   : > { %v1659_v24 = vmax.bf16 %v1658_v7, %v1545_v16  ;;  %v1693_v11 = vmax.bf16 %v1692_v8, %v1547_v17 }
 0x3c1   : > { %v1368_v25 = vpop.f32.mrb[72].mxu0  ;;  %v1481_v27 = vpop.f32.mrb[72].mxu1 }
 0x3c2   : > { %v1370_v20 = vpop.f32.mrb[73].mxu0  ;;  %v1483_v23 = vpop.f32.mrb[73].mxu1 }
 0x3c3   : > { %v1372_v26 = vpop.f32.mrb[74].mxu0  ;;  %v1485_v28 = vpop.f32.mrb[74].mxu1 }
 0x3c4   : > { %v1552_v29 = vpack.c.bf16 %v1372_v26, %v1368_v25  ;;  %v1554_v30 = vpack.c.bf16 %v1485_v28, %v1481_v27  ;;  %v1374_v31 = vpop.f32.mrb[75].mxu0  ;;  %v1487_v32 = vpop.f32.mrb[75].mxu1 }
 0x3c5   : > { %v1553_v35 = vpack.c.bf16 %v1374_v31, %v1370_v20  ;;  %v1555_v36 = vpack.c.bf16 %v1487_v32, %v1483_v23 }
 0x3c6   : > { %v1643_v39 = vmax.bf16 %v1642_v18, %v1552_v29  ;;  %v1677_v40 = vmax.bf16 %v1676_v22, %v1554_v30 }
 0x3c7   : > { %v1660_v42 = vmax.bf16 %v1659_v24, %v1553_v35  ;;  %v1694_v43 = vmax.bf16 %v1693_v11, %v1555_v36 }
 0x3c9   : > { %v1378_v44 = vpop.f32.mrb[76].mxu0  ;;  %v1491_v45 = vpop.f32.mrb[76].mxu1 }
 0x3ca   : > { %v1380_v47 = vpop.f32.mrb[77].mxu0  ;;  %v1493_v48 = vpop.f32.mrb[77].mxu1 }
 0x3cb   : > { %v1382_v49 = vpop.f32.mrb[78].mxu0  ;;  %v1495_v50 = vpop.f32.mrb[78].mxu1 }
 0x3cc   : > { %v1560_v51 = vpack.c.bf16 %v1382_v49, %v1378_v44  ;;  %v1562_v52 = vpack.c.bf16 %v1495_v50, %v1491_v45  ;;  %v1384_v53 = vpop.f32.mrb[79].mxu0  ;;  %v1497_v54 = vpop.f32.mrb[79].mxu1  ;;  %v1762_v50 = vrot.slane %v1754_v41, %v2605_v19 }
 0x3cd   : > { %v1561_v55 = vpack.c.bf16 %v1384_v53, %v1380_v47  ;;  %v1563_v56 = vpack.c.bf16 %v1497_v54, %v1493_v48 }
 0x3ce   : > { %v1644_v57 = vmax.bf16 %v1643_v39, %v1560_v51  ;;  %v1678_v58 = vmax.bf16 %v1677_v40, %v1562_v52 }
 0x3cf   : > { %v1661_v59 = vmax.bf16 %v1660_v42, %v1561_v55  ;;  %v1695_v60 = vmax.bf16 %v1694_v43, %v1563_v56 }
 0x3d0   : > { %v1645_v61 = vunpack.i.l.bf16 %v1644_v57  ;;  %v1646_v62 = vunpack.i.h.bf16 %v1644_v57  ;;  %v1679_v63 = vunpack.i.l.bf16 %v1678_v58  ;;  %v1680_v0 = vunpack.i.h.bf16 %v1678_v58 }
 0x3d1   : > { %v1662_v1 = vunpack.i.l.bf16 %v1661_v59  ;;  %v1663_v3 = vunpack.i.h.bf16 %v1661_v59  ;;  %v1696_v4 = vunpack.i.l.bf16 %v1695_v60  ;;  %v1697_v5 = vunpack.i.h.bf16 %v1695_v60 }
 0x3d2   : > { %v1647_v6 = vmax.f32 %v1645_v61, %v1646_v62  ;;  %v1681_v21 = vmax.f32 %v1679_v63, %v1680_v0 }
 0x3d3   : > { %v1664_v7 = vmax.f32 %v1662_v1, %v1663_v3  ;;  %v1698_v8 = vmax.f32 %v1696_v4, %v1697_v5 }
 0x3d4   : > { %v1648_v9 = vrot.slane %v1647_v6, 4  ;;  %v1682_v37 = vrot.slane %v1681_v21, 4 }
 0x3d5   : > { %v1665_v38 = vrot.slane %v1664_v7, 4  ;;  %v1699_v2 = vrot.slane %v1698_v8, 4 }
 0x3d6   : > { %v1649_v46 = vmax.f32 %v1647_v6, %v1648_v9  ;;  %v1683_v10 = vmax.f32 %v1681_v21, %v1682_v37 }
 0x3d7   : > { %v1666_v12 = vmax.f32 %v1664_v7, %v1665_v38  ;;  %v1700_v13 = vmax.f32 %v1698_v8, %v1699_v2 }
 0x3d8   : > { %v1650_v14 = vrot.slane %v1649_v46, 2  ;;  %v1684_v15 = vrot.slane %v1683_v10, 2 }
 0x3d9   : > { %v1667_v16 = vrot.slane %v1666_v12, 2  ;;  %v1701_v17 = vrot.slane %v1700_v13, 2 }
 0x3da   : > { %v1651_v18 = vmax.f32 %v1649_v46, %v1650_v14  ;;  %v1685_v22 = vmax.f32 %v1683_v10, %v1684_v15 }
 0x3db   : > { %v1668_v24 = vmax.f32 %v1666_v12, %v1667_v16  ;;  %v1702_v11 = vmax.f32 %v1700_v13, %v1701_v17 }
 0x3dc   : > { %v1652_v25 = vrot.slane %v1651_v18, 1  ;;  %v1686_v27 = vrot.slane %v1685_v22, 1 }
 0x3dd   : > { %v1669_v20 = vrot.slane %v1668_v24, 1  ;;  %v1703_v23 = vrot.slane %v1702_v11, 1 }
 0x3de   : > { %v1653_v26 = vmax.f32 %v1651_v18, %v1652_v25  ;;  %v1687_v28 = vmax.f32 %v1685_v22, %v1686_v27 }
 0x3df   : > { %v1670_v29 = vmax.f32 %v1668_v24, %v1669_v20  ;;  %v1704_v30 = vmax.f32 %v1702_v11, %v1703_v23 }
 0x3e0   : > { %v1654_v31 = vpack.i.bf16 %v1653_v26, %v1653_v26  ;;  %v1688_v32 = vpack.i.bf16 %v1687_v28, %v1687_v28 }
 0x3e1   : > { %v1671_v35 = vpack.i.bf16 %v1670_v29, %v1670_v29  ;;  %v1705_v36 = vpack.i.bf16 %v1704_v30, %v1704_v30 }
 0x3e2   : > { %v1710_v39 = vunpack.c.l.bf16 %v1654_v31  ;;  %v1712_v40 = vunpack.c.l.bf16 %v1688_v32 }
 0x3e3   : > { %v1711_v42 = vunpack.c.l.bf16 %v1671_v35  ;;  %v1713_v43 = vunpack.c.l.bf16 %v1705_v36 }
 0x3e5   : > { %v1724_v44 = vcombine.low %v1710_v39, %v1711_v42  ;;  %v1725_v45 = vcombine.low %v1712_v40, %v1713_v43 }
 0x3e7   : > { %v1746_v47 = vrot.slane %v1724_v44, %v2605_v19  ;;  %v1753_v48 = vrot.slane %v1725_v45, %v2605_v19 }
 0x3e9   : > { %v1755_v49 = vcombine.low %v1746_v47, %v1753_v48 }
 0x3eb   : > { %v1769_v51 = vrot.slane %v1755_v49, %v2605_v19 }
 0x3ed   : > { %v1770_v52 = vcombine.low %v1762_v50, %v1769_v51 }
 0x3ef   : > { %1773 = vst [vmem:[%s292_s16] sm:$0xff] %v1770_v52 }
 0x3f0   : > { %2204 = shalt.err (!%p2201_p6)
}
 0x3f1   : > { %s2205_s12 = scalar_lea.hbm %s2627_s17, 128  ;;  %s2209_s13 = scalar_lea.hbm %s2680_s6, 256 }
 0x3f2   : > { %p2206_p7 = scmp.ne.s32.totalorder %s2627_s17, %s2205_s12  ;;  %p2210_p0 = scmp.lt.u32.totalorder %s2627_s17, %s2680_s6 }
 0x3f3   : > { %p2211_p1 = scmp.lt.u32.totalorder %s2209_s13, %s2205_s12  ;;  %p2213_p13 = scmp.lt.u32.totalorder %s2205_s12, %s2627_s17 }
 0x3f4   : > { %p2207_p9 = pnand %p2206_p7, %p2696_p8 }
 0x3f5   : > { %p2212_p4 = por %p2211_p1, %p2210_p0 }
 0x3f6   : > { %p2208_p12 = pneg %p2207_p9 }
 0x3f7   : > { %p2214_p10 = por %p2213_p13, %p2212_p4 }
 0x3f9   : > { %p2215_p11 = pnand %p2214_p10, %p2208_p12 }
 0x3fb   : > { %2218 = shalt.err (!%p2215_p11)
}
 0x3fc   : > { %2055 = dma.vmem_to_hbm [thread:$0]  (%p2696_p8), %s2629_s18, 128, %s2627_s17, %s1775_s19  }
 0x3fd PF: > { %p2072_p2 = scmp.ge.s32.totalorder %s2277_s26, 2  ;;  %s1801_s29 = sand.u32 1, %s2257_s21  }
 0x3fe   : > { %p2697_p3 = scmp.ne.s32.totalorder %s2690_s9, 0  ;;  %s1802_s16 = scalar_lea.sflag [#allocation4], %s1801_s29 }
 0x400   : > { %p2065_p5 = pnand %p2072_p2, %p2697_p3 }
 0x402   : > { %2252 = dma.done.wait (!%p2065_p5), %s1802_s16, 128  }
 0x403   : > { %2254 = vsyncadd (!%p2065_p5), %s1802_s16, 4294967168  ;;  %s21_s26 = sadd.s32 1, %s2277_s26   ;;  %s2698_s24 = sld [smem:[#allocation11_spill]] }
 0x404   : > { %p18_p6 = scmp.ge.s32.totalorder %s21_s26, 4   ;;  %s2699_s25 = sld [smem:[#allocation12_spill]] }
 0x405   : > { %s2700_s21 = smov %s2261_s22  ;;  %s2701_s22 = smov %s2265_s23 }
 0x406   : > { %s2702_s23 = smov %s2377_s10  ;;  %20 = sbr.rel (!%p18_p6) target bundleno = 6 (0x6), region = 92 }
 0x40d   :  { %1807 = vsyncpa [#allocation3], 1 }
 0x40e   :  { %1809 = vsyncpa [#allocation3 + $0x1], 1 }
 0x40f   :  { %1810 = vsyncpa [#allocation6], 1 }
 0x410   :  { %1811 = vsyncpa [#allocation4], 1 }
 0x411   :  { %1813 = vsyncpa [#allocation4 + $0x1], 1 }

</bundles_post_ra>
